<compile_context>
chip_gen: v5e
topology: v5e:2x2
jax: 0.10.0
libtpu: 0.0.40
codegen_flags: <defaults>
</compile_context>

<pallas_src>
import jax
import jax.numpy as jnp
import numpy as np
from jax.experimental import pallas as pl
from jax.experimental.pallas import tpu as pltpu


# ----------------------------------------------------------------------------
# Fused kernel: maxpool -> PAM -> 1x1 conv -> separable bilinear 2x upsample
# ----------------------------------------------------------------------------
def _down_kernel(gamma_ref, xw_ref, wqkv_ref, bqkv_ref, wc_ref, bc_ref,
                 uw_ref, uh_ref, o_ref):
    f32 = jnp.float32
    bf16 = jnp.bfloat16

    c = xw_ref.shape[3]
    wo, wp = uw_ref.shape
    ho, hp = uh_ref.shape
    cpad = (wqkv_ref.shape[1] - c) // 2     # padded q/k width (>= 128)
    cout = wc_ref.shape[1]

    # ---- MaxPool2d(2): elementwise max of the four 2x2 taps (input dtype) --
    xt = jnp.maximum(jnp.maximum(xw_ref[0, 0], xw_ref[0, 1]),
                     jnp.maximum(xw_ref[0, 2], xw_ref[0, 3]))          # (S, C)
    xt_f32 = xt.astype(f32)
    xt_b = xt.astype(bf16)

    # ---- PAM: fused q|k|v 1x1 projections (one bf16 MXU matmul) ------------
    qkv = jnp.dot(xt_b, wqkv_ref[...],
                  preferred_element_type=f32) + bqkv_ref[...]          # (S, 2*cpad+C)
    q = qkv[:, :cpad].astype(bf16)            # zero-padded lanes -> exact q.k^T
    k = qkv[:, cpad:2 * cpad].astype(bf16)
    v = qkv[:, 2 * cpad:].astype(bf16)        # (S, C)

    # energy[i, j] = q[i] . k[j]   (contract channels; padded lanes are zero)
    energy = jax.lax.dot_general(q, k, (((1,), (1,)), ((), ())),
                                 preferred_element_type=f32)           # (S, S)

    # softmax, normalization deferred to the EUP reciprocal
    m = jnp.max(energy, axis=-1, keepdims=True)
    p = jnp.exp(energy - m)
    l = jnp.sum(p, axis=-1, keepdims=True)
    ctx = jnp.dot(p.astype(bf16), v, preferred_element_type=f32)       # (S, C)
    ctx = ctx * pl.reciprocal(l, approx=True)

    # residual with learnable gamma (SMEM scalar)
    pam = gamma_ref[0] * ctx + xt_f32                                  # (S, C)

    # ---- 1x1 output conv, hoisted BEFORE the upsample (exact: the upsample
    #      is linear and its interpolation rows sum to 1, so weight and bias
    #      both commute with it).  Keeps everything downstream lane-dense. ---
    y = jnp.dot(pam.astype(bf16), wc_ref[...],
                preferred_element_type=f32) + bc_ref[...]              # (S, Cout)

    # ---- bilinear 2x upsample (align_corners=True), separable ---------------
    # width pass: batched matmul over the Hp pooled rows
    y3 = y.astype(bf16).reshape(hp, wp, cout)                          # major split
    uwb = jnp.broadcast_to(uw_ref[...][None, :, :], (hp, wo, wp))
    tw = jnp.einsum('how,hwc->hoc', uwb, y3,
                    preferred_element_type=f32)                        # (Hp, Wo, Cout)
    tw = tw.astype(bf16)
    # lay the width-upsampled columns out on the lane axis: (Hp, Wo*Cout)
    tw2 = jnp.concatenate([tw[:, o, :] for o in range(wo)], axis=1)
    # height pass: one clean (Ho, Hp) @ (Hp, Wo*Cout) MXU matmul
    out = jnp.dot(uh_ref[...], tw2, preferred_element_type=f32)        # (Ho, Wo*Cout)

    o_ref[0] = out.astype(o_ref.dtype)


# ----------------------------------------------------------------------------
# Bilinear interpolation matrix (nn.Upsample, mode='bilinear',
# align_corners=True); returns (n_out, n_in), rows sum to 1.
# ----------------------------------------------------------------------------
def _bilinear_matrix(n_in, n_out):
    if n_in == 1:
        return np.ones((n_out, 1), np.float32)
    src = np.arange(n_out, dtype=np.float64) * (n_in - 1) / (n_out - 1)
    i0 = np.clip(np.floor(src).astype(np.int64), 0, n_in - 1)
    i1 = np.clip(i0 + 1, 0, n_in - 1)
    w1 = src - i0
    w0 = 1.0 - w1
    u = np.zeros((n_out, n_in), np.float64)
    rows = np.arange(n_out)
    np.add.at(u, (rows, i0), w0)
    np.add.at(u, (rows, i1), w1)
    return u.astype(np.float32)


def _round_up(n, m):
    return ((n + m - 1) // m) * m


# ----------------------------------------------------------------------------
# Down.forward equivalent
# ----------------------------------------------------------------------------
def down_forward(x, params):
    """x: (B, C_in, H, W) NCHW.  Returns (B, C_out, H, W)."""
    B, C, H, W = x.shape
    assert H % 2 == 0 and W % 2 == 0
    Hp, Wp = H // 2, W // 2
    S = Hp * Wp
    Ho, Wo = H, W

    wq, bq = params["wq"], params["bq"]      # (C, C8), (1, C8)
    wk, bk = params["wk"], params["bk"]      # (C, C8), (1, C8)
    wv, bv = params["wv"], params["bv"]      # (C, C),  (1, C)
    wc, bc = params["wc"], params["bc"]      # (C, Cout), (1, Cout)
    gamma = params["gamma"]                  # (1,)
    C8 = wq.shape[1]
    Cout = wc.shape[1]

    bf16 = jnp.bfloat16
    # Fuse q|k|v into one weight; zero-pad q/k width to a lane-dense >=128
    # (padded columns/biases are zero, so q.k^T is unchanged).
    CPAD = max(128, _round_up(C8, 128))
    padq = ((0, 0), (0, CPAD - C8))
    wqkv = jnp.concatenate([jnp.pad(wq, padq), jnp.pad(wk, padq), wv],
                           axis=1).astype(bf16)                  # (C, 2*CPAD+C)
    bqkv = jnp.concatenate([jnp.pad(bq, padq), jnp.pad(bk, padq), bv],
                           axis=1)                               # (1, 2*CPAD+C) f32
    wc_b = wc.astype(bf16)

    # Separable bilinear factors (tiny, replaces the old (So, S) kron matrix).
    uw = jnp.asarray(_bilinear_matrix(Wp, Wo)).astype(bf16)      # (Wo, Wp)
    uh = jnp.asarray(_bilinear_matrix(Hp, Ho)).astype(bf16)      # (Ho, Hp)

    # Layout plumbing only: expose the four 2x2 pooling taps as a leading axis
    # of 4, tokens (pooled positions, row-major h*Wp+w) on sublanes, channels
    # on lanes -> (B, 4, S, C).  Kept in the input dtype.
    xw = x.reshape(B, C, Hp, 2, Wp, 2)
    xw = jnp.transpose(xw, (0, 3, 5, 2, 4, 1)).reshape(B, 4, S, C)

    def const(*shape):
        return pl.BlockSpec(shape, lambda b: (0,) * len(shape))

    out = pl.pallas_call(
        _down_kernel,
        # lane-dense output: trailing dim is Wo*Cout (>= 128)
        out_shape=jax.ShapeDtypeStruct((B, Ho, Wo * Cout), x.dtype),
        grid=(B,),
        in_specs=[
            pl.BlockSpec(memory_space=pltpu.MemorySpace.SMEM),     # gamma (scalar)
            pl.BlockSpec((1, 4, S, C), lambda b: (b, 0, 0, 0)),    # pooling taps
            const(C, 2 * CPAD + C), const(1, 2 * CPAD + C),        # fused Wqkv, bqkv
            const(C, Cout), const(1, Cout),                        # Wc^T, bc
            const(Wo, Wp),                                         # width factor
            const(Ho, Hp),                                         # height factor
        ],
        out_specs=pl.BlockSpec((1, Ho, Wo * Cout), lambda b: (b, 0, 0)),
        compiler_params=pltpu.CompilerParams(
            dimension_semantics=("parallel",)),
    )(gamma, xw, wqkv, bqkv, wc_b, bc, uw, uh)

    # (B, Ho, Wo*Cout) -> (B, Cout, Ho, Wo)   (layout plumbing only)
    return jnp.transpose(out.reshape(B, Ho, Wo, Cout), (0, 3, 1, 2))


# ----------------------------------------------------------------------------
# Pure-JAX reference (same math as the PyTorch module, f32, XLA ops).
# ----------------------------------------------------------------------------
def down_reference(x, params):
    B, C, H, W = x.shape
    Hp, Wp = H // 2, W // 2
    Ho, Wo = H, W
    hi = jax.lax.Precision.HIGHEST

    xp = x.reshape(B, C, Hp, 2, Wp, 2).max(axis=(3, 5))              # maxpool
    xt = xp.reshape(B, C, Hp * Wp)                                   # (B, C, S)

    q = jnp.einsum('bcs,cd->bsd', xt, params["wq"], precision=hi) + params["bq"]
    k = jnp.einsum('bcs,cd->bsd', xt, params["wk"], precision=hi) + params["bk"]
    v = jnp.einsum('bcs,cd->bsd', xt, params["wv"], precision=hi) + params["bv"]
    e = jnp.einsum('bsd,btd->bst', q, k, precision=hi)
    a = jax.nn.softmax(e, axis=-1)
    ctx = jnp.einsum('bst,btc->bsc', a, v, precision=hi)
    pam = params["gamma"][0] * ctx + jnp.transpose(xt, (0, 2, 1))    # (B, S, C)
    pam = pam.reshape(B, Hp, Wp, C)

    uh = jnp.asarray(_bilinear_matrix(Hp, Ho))
    uw = jnp.asarray(_bilinear_matrix(Wp, Wo))
    up = jnp.einsum('gh,bhwc->bgwc', uh, pam, precision=hi)
    up = jnp.einsum('ow,bgwc->bgoc', uw, up, precision=hi)           # (B, Ho, Wo, C)
    out = jnp.einsum('bgoc,cd->bgod', up, params["wc"], precision=hi) + params["bc"]
    return jnp.transpose(out, (0, 3, 1, 2))


# ----------------------------------------------------------------------------
# Parameter init (deterministic; Conv2d-style fan-in uniform; weights stored
# pre-transposed as (C_in, C_out) so the kernel consumes them directly).
# ----------------------------------------------------------------------------
def init_params(key, in_channels, out_channels):
    C = in_channels
    C8 = max(1, C // 8)
    ks = jax.random.split(key, 8)

    def w(kk, cin, cout):
        bound = 1.0 / np.sqrt(cin)
        return jax.random.uniform(kk, (cin, cout), jnp.float32, -bound, bound)

    def b(kk, cin, cout):
        bound = 1.0 / np.sqrt(cin)
        return jax.random.uniform(kk, (1, cout), jnp.float32, -bound, bound)

    return {
        "wq": w(ks[0], C, C8), "bq": b(ks[1], C, C8),
        "wk": w(ks[2], C, C8), "bk": b(ks[3], C, C8),
        "wv": w(ks[4], C, C),  "bv": b(ks[5], C, C),
        # PAM gamma defaults to 0 in PyTorch; use a nonzero value so the
        # attention path contributes in the smoke test.
        "gamma": jnp.array([0.3], jnp.float32),
        "wc": w(ks[6], C, out_channels), "bc": b(ks[7], C, out_channels),
    }


if __name__ == "__main__":
    B, C_in, C_out, H, W = 2, 16, 32, 16, 16

    key = jax.random.PRNGKey(0)
    kx, kp = jax.random.split(key)
    x = jax.random.normal(kx, (B, C_in, H, W), jnp.float32)
    params = init_params(kp, C_in, C_out)

    y = jax.jit(down_forward)(x, params)
    jax.block_until_ready(y)

    assert y.shape == (B, C_out, H, W)
    assert bool(jnp.all(jnp.isfinite(y)))

    # bf16 MXU operands (f32 accumulation) vs. f32 reference -> loose tolerance
    y_ref = down_reference(x, params)
    np.testing.assert_allclose(np.asarray(y), np.asarray(y_ref),
                               rtol=5e-2, atol=5e-2)
    print("KERNEL_OK")
</pallas_src>

<mosaic_0001>
module attributes {stable_mosaic.version = 11 : i64} {
  func.func @_down_kernel(%arg0: i32, %arg1: memref<1xf32, #tpu.memory_space<smem>>, %arg2: memref<1x4x64x16xf32, #tpu.memory_space<vmem>>, %arg3: memref<16x272xbf16, #tpu.memory_space<vmem>>, %arg4: memref<1x272xf32, #tpu.memory_space<vmem>>, %arg5: memref<16x32xbf16, #tpu.memory_space<vmem>>, %arg6: memref<1x32xf32, #tpu.memory_space<vmem>>, %arg7: memref<16x8xbf16, #tpu.memory_space<vmem>>, %arg8: memref<16x8xbf16, #tpu.memory_space<vmem>>, %arg9: memref<1x16x512xf32, #tpu.memory_space<vmem>>) attributes {dimension_semantics = [#tpu.dimension_semantics<parallel>], iteration_bounds = array<i64: 2>, scalar_prefetch = 0 : i64, scratch_operands = 0 : i64, tpu.core_type = #tpu.core_type<tc>, window_params = [{transform_indices = @transform_0, window_bounds = array<i64: 1>}, {transform_indices = @transform_1, window_bounds = array<i64: 1, 4, 64, 16>}, {pipeline_mode = #tpu.pipeline_mode<synchronous>, transform_indices = @transform_2, window_bounds = array<i64: 16, 272>}, {pipeline_mode = #tpu.pipeline_mode<synchronous>, transform_indices = @transform_3, window_bounds = array<i64: 1, 272>}, {pipeline_mode = #tpu.pipeline_mode<synchronous>, transform_indices = @transform_4, window_bounds = array<i64: 16, 32>}, {pipeline_mode = #tpu.pipeline_mode<synchronous>, transform_indices = @transform_5, window_bounds = array<i64: 1, 32>}, {pipeline_mode = #tpu.pipeline_mode<synchronous>, transform_indices = @transform_6, window_bounds = array<i64: 16, 8>}, {pipeline_mode = #tpu.pipeline_mode<synchronous>, transform_indices = @transform_7, window_bounds = array<i64: 16, 8>}, {transform_indices = @transform_8, window_bounds = array<i64: 1, 16, 512>}]} {
    %c0 = arith.constant 0 : index
    %c0_0 = arith.constant 0 : index
    %c0_1 = arith.constant 0 : index
    %c0_2 = arith.constant 0 : index
    %0 = vector.load %arg2[%c0, %c0_0, %c0_1, %c0_2] : memref<1x4x64x16xf32, #tpu.memory_space<vmem>>, vector<1x1x64x16xf32>
    %1 = vector.shape_cast %0 : vector<1x1x64x16xf32> to vector<64x16xf32>
    %c0_3 = arith.constant 0 : index
    %c1 = arith.constant 1 : index
    %c0_4 = arith.constant 0 : index
    %c0_5 = arith.constant 0 : index
    %2 = vector.load %arg2[%c0_3, %c1, %c0_4, %c0_5] : memref<1x4x64x16xf32, #tpu.memory_space<vmem>>, vector<1x1x64x16xf32>
    %3 = vector.shape_cast %2 : vector<1x1x64x16xf32> to vector<64x16xf32>
    %4 = arith.maximumf %1, %3 : vector<64x16xf32>
    %c0_6 = arith.constant 0 : index
    %c2 = arith.constant 2 : index
    %c0_7 = arith.constant 0 : index
    %c0_8 = arith.constant 0 : index
    %5 = vector.load %arg2[%c0_6, %c2, %c0_7, %c0_8] : memref<1x4x64x16xf32, #tpu.memory_space<vmem>>, vector<1x1x64x16xf32>
    %6 = vector.shape_cast %5 : vector<1x1x64x16xf32> to vector<64x16xf32>
    %c0_9 = arith.constant 0 : index
    %c3 = arith.constant 3 : index
    %c0_10 = arith.constant 0 : index
    %c0_11 = arith.constant 0 : index
    %7 = vector.load %arg2[%c0_9, %c3, %c0_10, %c0_11] : memref<1x4x64x16xf32, #tpu.memory_space<vmem>>, vector<1x1x64x16xf32>
    %8 = vector.shape_cast %7 : vector<1x1x64x16xf32> to vector<64x16xf32>
    %9 = arith.maximumf %6, %8 : vector<64x16xf32>
    %10 = arith.maximumf %4, %9 : vector<64x16xf32>
    %11 = arith.truncf %10 : vector<64x16xf32> to vector<64x16xbf16>
    %c0_12 = arith.constant 0 : index
    %c0_13 = arith.constant 0 : index
    %12 = vector.load %arg3[%c0_12, %c0_13] : memref<16x272xbf16, #tpu.memory_space<vmem>>, vector<16x272xbf16>
    %cst = arith.constant dense<0.000000e+00> : vector<64x272xf32>
    %13 = tpu.matmul %11, %12, %cst {dimension_numbers = #tpu.dot_dimension_numbers<[1], [0], [0], [1], [0, 0, 1, 1], [], []>} : vector<64x16xbf16>, vector<16x272xbf16>, vector<64x272xf32> -> vector<64x272xf32>
    %c0_14 = arith.constant 0 : index
    %c0_15 = arith.constant 0 : index
    %14 = vector.load %arg4[%c0_14, %c0_15] : memref<1x272xf32, #tpu.memory_space<vmem>>, vector<1x272xf32>
    %15 = vector.broadcast %14 : vector<1x272xf32> to vector<64x272xf32>
    %16 = arith.addf %13, %15 : vector<64x272xf32>
    %17 = vector.extract_strided_slice %16 {offsets = [0, 0], sizes = [64, 128], strides = [1, 1]} : vector<64x272xf32> to vector<64x128xf32>
    %18 = arith.truncf %17 : vector<64x128xf32> to vector<64x128xbf16>
    %19 = vector.extract_strided_slice %16 {offsets = [0, 128], sizes = [64, 128], strides = [1, 1]} : vector<64x272xf32> to vector<64x128xf32>
    %20 = arith.truncf %19 : vector<64x128xf32> to vector<64x128xbf16>
    %21 = vector.extract_strided_slice %16 {offsets = [0, 256], sizes = [64, 16], strides = [1, 1]} : vector<64x272xf32> to vector<64x16xf32>
    %22 = arith.truncf %21 : vector<64x16xf32> to vector<64x16xbf16>
    %cst_16 = arith.constant dense<0.000000e+00> : vector<64x64xf32>
    %23 = tpu.matmul %18, %20, %cst_16 {dimension_numbers = #tpu.dot_dimension_numbers<[1], [1], [0], [0], [0, 0, 1, 0], [], []>} : vector<64x128xbf16>, vector<64x128xbf16>, vector<64x64xf32> -> vector<64x64xf32>
    %cst_17 = arith.constant dense<0xFF800000> : vector<64xf32>
    %24 = vector.multi_reduction <maximumf>, %23, %cst_17 [1] : vector<64x64xf32> to vector<64xf32>
    %25 = vector.shape_cast %24 : vector<64xf32> to vector<64x1xf32>
    %26 = vector.broadcast %25 : vector<64x1xf32> to vector<64x64xf32>
    %27 = arith.subf %23, %26 : vector<64x64xf32>
    %28 = math.exp %27 : vector<64x64xf32>
    %cst_18 = arith.constant dense<0.000000e+00> : vector<64xf32>
    %29 = vector.multi_reduction <add>, %28, %cst_18 [1] : vector<64x64xf32> to vector<64xf32>
    %30 = vector.shape_cast %29 : vector<64xf32> to vector<64x1xf32>
    %31 = arith.truncf %28 : vector<64x64xf32> to vector<64x64xbf16>
    %cst_19 = arith.constant dense<0.000000e+00> : vector<64x16xf32>
    %32 = tpu.matmul %31, %22, %cst_19 {dimension_numbers = #tpu.dot_dimension_numbers<[1], [0], [0], [1], [0, 0, 1, 1], [], []>} : vector<64x64xbf16>, vector<64x16xbf16>, vector<64x16xf32> -> vector<64x16xf32>
    %33 = tpu.reciprocal %30 {approx = true} : vector<64x1xf32> -> vector<64x1xf32>
    %34 = vector.broadcast %33 : vector<64x1xf32> to vector<64x16xf32>
    %35 = arith.mulf %32, %34 : vector<64x16xf32>
    %c0_20 = arith.constant 0 : index
    %36 = memref.load %arg1[%c0_20] : memref<1xf32, #tpu.memory_space<smem>>
    %37 = vector.broadcast %36 : f32 to vector<64x16xf32>
    %38 = arith.mulf %37, %35 : vector<64x16xf32>
    %39 = arith.addf %38, %10 : vector<64x16xf32>
    %40 = arith.truncf %39 : vector<64x16xf32> to vector<64x16xbf16>
    %c0_21 = arith.constant 0 : index
    %c0_22 = arith.constant 0 : index
    %41 = vector.load %arg5[%c0_21, %c0_22] : memref<16x32xbf16, #tpu.memory_space<vmem>>, vector<16x32xbf16>
    %cst_23 = arith.constant dense<0.000000e+00> : vector<64x32xf32>
    %42 = tpu.matmul %40, %41, %cst_23 {dimension_numbers = #tpu.dot_dimension_numbers<[1], [0], [0], [1], [0, 0, 1, 1], [], []>} : vector<64x16xbf16>, vector<16x32xbf16>, vector<64x32xf32> -> vector<64x32xf32>
    %c0_24 = arith.constant 0 : index
    %c0_25 = arith.constant 0 : index
    %43 = vector.load %arg6[%c0_24, %c0_25] : memref<1x32xf32, #tpu.memory_space<vmem>>, vector<1x32xf32>
    %44 = vector.broadcast %43 : vector<1x32xf32> to vector<64x32xf32>
    %45 = arith.addf %42, %44 : vector<64x32xf32>
    %46 = arith.truncf %45 : vector<64x32xf32> to vector<64x32xbf16>
    %47 = vector.shape_cast %46 : vector<64x32xbf16> to vector<8x8x32xbf16>
    %c0_26 = arith.constant 0 : index
    %c0_27 = arith.constant 0 : index
    %48 = vector.load %arg7[%c0_26, %c0_27] : memref<16x8xbf16, #tpu.memory_space<vmem>>, vector<16x8xbf16>
    %49 = vector.shape_cast %48 : vector<16x8xbf16> to vector<1x16x8xbf16>
    %50 = vector.shape_cast %49 : vector<1x16x8xbf16> to vector<1x16x8xbf16>
    %51 = vector.broadcast %50 : vector<1x16x8xbf16> to vector<8x16x8xbf16>
    "tpu.trace_start"() <{level = 10 : i32, message = "how,hwc->hoc"}> : () -> ()
    %cst_28 = arith.constant dense<0.000000e+00> : vector<8x16x32xf32>
    %52 = tpu.matmul %51, %47, %cst_28 {dimension_numbers = #tpu.dot_dimension_numbers<[2], [1], [1], [2], [0, 0, 0, 1, 1, 2], [0], [0]>} : vector<8x16x8xbf16>, vector<8x8x32xbf16>, vector<8x16x32xf32> -> vector<8x16x32xf32>
    "tpu.trace_stop"() : () -> ()
    %53 = arith.truncf %52 : vector<8x16x32xf32> to vector<8x16x32xbf16>
    %54 = vector.extract_strided_slice %53 {offsets = [0, 0, 0], sizes = [8, 1, 32], strides = [1, 1, 1]} : vector<8x16x32xbf16> to vector<8x1x32xbf16>
    %55 = vector.shape_cast %54 : vector<8x1x32xbf16> to vector<8x32xbf16>
    %56 = vector.extract_strided_slice %53 {offsets = [0, 1, 0], sizes = [8, 1, 32], strides = [1, 1, 1]} : vector<8x16x32xbf16> to vector<8x1x32xbf16>
    %57 = vector.shape_cast %56 : vector<8x1x32xbf16> to vector<8x32xbf16>
    %58 = vector.extract_strided_slice %53 {offsets = [0, 2, 0], sizes = [8, 1, 32], strides = [1, 1, 1]} : vector<8x16x32xbf16> to vector<8x1x32xbf16>
    %59 = vector.shape_cast %58 : vector<8x1x32xbf16> to vector<8x32xbf16>
    %60 = vector.extract_strided_slice %53 {offsets = [0, 3, 0], sizes = [8, 1, 32], strides = [1, 1, 1]} : vector<8x16x32xbf16> to vector<8x1x32xbf16>
    %61 = vector.shape_cast %60 : vector<8x1x32xbf16> to vector<8x32xbf16>
    %62 = vector.extract_strided_slice %53 {offsets = [0, 4, 0], sizes = [8, 1, 32], strides = [1, 1, 1]} : vector<8x16x32xbf16> to vector<8x1x32xbf16>
    %63 = vector.shape_cast %62 : vector<8x1x32xbf16> to vector<8x32xbf16>
    %64 = vector.extract_strided_slice %53 {offsets = [0, 5, 0], sizes = [8, 1, 32], strides = [1, 1, 1]} : vector<8x16x32xbf16> to vector<8x1x32xbf16>
    %65 = vector.shape_cast %64 : vector<8x1x32xbf16> to vector<8x32xbf16>
    %66 = vector.extract_strided_slice %53 {offsets = [0, 6, 0], sizes = [8, 1, 32], strides = [1, 1, 1]} : vector<8x16x32xbf16> to vector<8x1x32xbf16>
    %67 = vector.shape_cast %66 : vector<8x1x32xbf16> to vector<8x32xbf16>
    %68 = vector.extract_strided_slice %53 {offsets = [0, 7, 0], sizes = [8, 1, 32], strides = [1, 1, 1]} : vector<8x16x32xbf16> to vector<8x1x32xbf16>
    %69 = vector.shape_cast %68 : vector<8x1x32xbf16> to vector<8x32xbf16>
    %70 = vector.extract_strided_slice %53 {offsets = [0, 8, 0], sizes = [8, 1, 32], strides = [1, 1, 1]} : vector<8x16x32xbf16> to vector<8x1x32xbf16>
    %71 = vector.shape_cast %70 : vector<8x1x32xbf16> to vector<8x32xbf16>
    %72 = vector.extract_strided_slice %53 {offsets = [0, 9, 0], sizes = [8, 1, 32], strides = [1, 1, 1]} : vector<8x16x32xbf16> to vector<8x1x32xbf16>
    %73 = vector.shape_cast %72 : vector<8x1x32xbf16> to vector<8x32xbf16>
    %74 = vector.extract_strided_slice %53 {offsets = [0, 10, 0], sizes = [8, 1, 32], strides = [1, 1, 1]} : vector<8x16x32xbf16> to vector<8x1x32xbf16>
    %75 = vector.shape_cast %74 : vector<8x1x32xbf16> to vector<8x32xbf16>
    %76 = vector.extract_strided_slice %53 {offsets = [0, 11, 0], sizes = [8, 1, 32], strides = [1, 1, 1]} : vector<8x16x32xbf16> to vector<8x1x32xbf16>
    %77 = vector.shape_cast %76 : vector<8x1x32xbf16> to vector<8x32xbf16>
    %78 = vector.extract_strided_slice %53 {offsets = [0, 12, 0], sizes = [8, 1, 32], strides = [1, 1, 1]} : vector<8x16x32xbf16> to vector<8x1x32xbf16>
    %79 = vector.shape_cast %78 : vector<8x1x32xbf16> to vector<8x32xbf16>
    %80 = vector.extract_strided_slice %53 {offsets = [0, 13, 0], sizes = [8, 1, 32], strides = [1, 1, 1]} : vector<8x16x32xbf16> to vector<8x1x32xbf16>
    %81 = vector.shape_cast %80 : vector<8x1x32xbf16> to vector<8x32xbf16>
    %82 = vector.extract_strided_slice %53 {offsets = [0, 14, 0], sizes = [8, 1, 32], strides = [1, 1, 1]} : vector<8x16x32xbf16> to vector<8x1x32xbf16>
    %83 = vector.shape_cast %82 : vector<8x1x32xbf16> to vector<8x32xbf16>
    %84 = vector.extract_strided_slice %53 {offsets = [0, 15, 0], sizes = [8, 1, 32], strides = [1, 1, 1]} : vector<8x16x32xbf16> to vector<8x1x32xbf16>
    %85 = vector.shape_cast %84 : vector<8x1x32xbf16> to vector<8x32xbf16>
    %86 = tpu.concatenate %55, %57, %59, %61, %63, %65, %67, %69, %71, %73, %75, %77, %79, %81, %83, %85 in 1 : vector<8x32xbf16>, vector<8x32xbf16>, vector<8x32xbf16>, vector<8x32xbf16>, vector<8x32xbf16>, vector<8x32xbf16>, vector<8x32xbf16>, vector<8x32xbf16>, vector<8x32xbf16>, vector<8x32xbf16>, vector<8x32xbf16>, vector<8x32xbf16>, vector<8x32xbf16>, vector<8x32xbf16>, vector<8x32xbf16>, vector<8x32xbf16> -> vector<8x512xbf16>
    %c0_29 = arith.constant 0 : index
    %c0_30 = arith.constant 0 : index
    %87 = vector.load %arg8[%c0_29, %c0_30] : memref<16x8xbf16, #tpu.memory_space<vmem>>, vector<16x8xbf16>
    %cst_31 = arith.constant dense<0.000000e+00> : vector<16x512xf32>
    %88 = tpu.matmul %87, %86, %cst_31 {dimension_numbers = #tpu.dot_dimension_numbers<[1], [0], [0], [1], [0, 0, 1, 1], [], []>} : vector<16x8xbf16>, vector<8x512xbf16>, vector<16x512xf32> -> vector<16x512xf32>
    %c0_32 = arith.constant 0 : index
    %c0_33 = arith.constant 0 : index
    %c0_34 = arith.constant 0 : index
    %89 = vector.load %arg9[%c0_32, %c0_33, %c0_34] : memref<1x16x512xf32, #tpu.memory_space<vmem>>, vector<1x16x512xf32>
    %90 = vector.shape_cast %89 : vector<1x16x512xf32> to vector<16x512xf32>
    %91 = vector.shape_cast %88 : vector<16x512xf32> to vector<1x16x512xf32>
    tpu.vector_store %arg9[%c0_32, %c0_33, %c0_34], %91 {strides = array<i32>} : memref<1x16x512xf32, #tpu.memory_space<vmem>>, vector<1x16x512xf32>,
    return
  }
  func.func @transform_0(%arg0: i32) -> i32 {
    %c0_i32 = arith.constant 0 : i32
    %c0_i32_0 = arith.constant 0 : i32
    return %c0_i32 : i32
  }
  func.func @transform_1(%arg0: i32) -> (i32, i32, i32, i32) {
    %c0_i32 = arith.constant 0 : i32
    %c0_i32_0 = arith.constant 0 : i32
    %c0_i32_1 = arith.constant 0 : i32
    %c0_i32_2 = arith.constant 0 : i32
    return %arg0, %c0_i32, %c0_i32_0, %c0_i32_1 : i32, i32, i32, i32
  }
  func.func @transform_2(%arg0: i32) -> (i32, i32) {
    %c0_i32 = arith.constant 0 : i32
    %c0_i32_0 = arith.constant 0 : i32
    %c0_i32_1 = arith.constant 0 : i32
    return %c0_i32, %c0_i32_0 : i32, i32
  }
  func.func @transform_3(%arg0: i32) -> (i32, i32) {
    %c0_i32 = arith.constant 0 : i32
    %c0_i32_0 = arith.constant 0 : i32
    %c0_i32_1 = arith.constant 0 : i32
    return %c0_i32, %c0_i32_0 : i32, i32
  }
  func.func @transform_4(%arg0: i32) -> (i32, i32) {
    %c0_i32 = arith.constant 0 : i32
    %c0_i32_0 = arith.constant 0 : i32
    %c0_i32_1 = arith.constant 0 : i32
    return %c0_i32, %c0_i32_0 : i32, i32
  }
  func.func @transform_5(%arg0: i32) -> (i32, i32) {
    %c0_i32 = arith.constant 0 : i32
    %c0_i32_0 = arith.constant 0 : i32
    %c0_i32_1 = arith.constant 0 : i32
    return %c0_i32, %c0_i32_0 : i32, i32
  }
  func.func @transform_6(%arg0: i32) -> (i32, i32) {
    %c0_i32 = arith.constant 0 : i32
    %c0_i32_0 = arith.constant 0 : i32
    %c0_i32_1 = arith.constant 0 : i32
    return %c0_i32, %c0_i32_0 : i32, i32
  }
  func.func @transform_7(%arg0: i32) -> (i32, i32) {
    %c0_i32 = arith.constant 0 : i32
    %c0_i32_0 = arith.constant 0 : i32
    %c0_i32_1 = arith.constant 0 : i32
    return %c0_i32, %c0_i32_0 : i32, i32
  }
  func.func @transform_8(%arg0: i32) -> (i32, i32, i32) {
    %c0_i32 = arith.constant 0 : i32
    %c0_i32_0 = arith.constant 0 : i32
    %c0_i32_1 = arith.constant 0 : i32
    return %arg0, %c0_i32, %c0_i32_0 : i32, i32, i32
  }
}

</mosaic_0001>

<bundles_post_ra>
// kernel: down_forward.1
= control target key start
LH: loop header
LB: loop body
LE: loop exit
PB: predicated region body
PF: predicated region fallthrough
CT: control target
= control target key end

     0   :  { %s1641_s29 = smov 0   ;;  %s2206_s0 = inlined_call_operand.<no memory space> [shape: f32[1], index: 0, kind: input, shape index: {}]   ;;  %s2207_s1 = inlined_call_operand.vmem [shape: f32[2,4,64,16], index: 1, kind: input, shape index: {}]   ;;  %s2208_s2 = inlined_call_operand.vmem [shape: bf16[16,272], index: 2, kind: input, shape index: {}]   ;;  %s2209_s3 = inlined_call_operand.vmem [shape: f32[1,272], index: 3, kind: input, shape index: {}]   ;;  %s2210_s4 = inlined_call_operand.vmem [shape: bf16[16,32], index: 4, kind: input, shape index: {}]   ;;  %s2211_s5 = inlined_call_operand.vmem [shape: f32[1,32], index: 5, kind: input, shape index: {}]   ;;  %s2212_s6 = inlined_call_operand.vmem [shape: bf16[16,8], index: 6, kind: input, shape index: {}, may-alias: {6,7}]   ;;  %s2213_s7 = inlined_call_operand.vmem [shape: bf16[16,8], index: 7, kind: input, shape index: {}, may-alias: {6,7}]   ;;  %s2214_s8 = inlined_call_operand.vmem [shape: f32[2,16,512], index: 8, kind: output, shape index: {}]  }
   0x1   :  { %13 = sst [smem:[#allocation2]] %s2206_s0 }
   0x2 LB: > { %s1423_s30 = sadd.s32 4294967295, %s1588_s29   ;;  %p1427_p0 = scmp.ge.s32.totalorder %s1588_s29, 1  ;;  %s1588_s29 = sphi %s1641_s29, %s19_s29  }
   0x3   : > { %p263_p1 = scmp.lt.s32.totalorder %s1588_s29, 3 }
   0x5   : > { %p264_p2 = pnand %p1427_p0, %p263_p1 }
   0x6   : > { %p297_p3 = scmp.lt.s32.totalorder (!%p264_p2), %s1423_s30, 1  ;;  %s674_s28 = sld [smem:[#allocation2]] (!%p264_p2) }
   0x7   : > { %267 = sbr.rel (%p264_p2) target bundleno = 1261 (0x4ed), region = 52  ;;  %s1591_s13 = smov (!%p264_p2), 32  }
   0x8   : > { %s1592_s14 = smov (!%p264_p2), 96  }
   0xc   : > { %v1532_v0 = vld [vmem:[%s2208_s2 + $0x4] sm:$0xf]  ;;  %v1460_v1 = vld [vmem:[%s2208_s2 + $0xc] sm:$0xf0]  ;;  %s2216_s30 = smov (!%p297_p3, %s1423_s30), 1  ;;  %vm399_vm0 = vcmask 130048  }
   0xd   : > { %v1463_v2 = vor.u32 %v1532_v0, %v1460_v1  ;;  %s1530_s12 = sshll.u32 %s2216_s30, 8  ;;  %v1458_v38 = vld [vmem:[%s2208_s2] sm:$0xf]  ;;  %v1533_v39 = vld [vmem:[%s2208_s2 + $0x8] sm:$0xf0]  ;;  %vm540_vm1 = vcmask 523264  }
   0xe   : > { %s1661_s15 = scalar_lea.vmem %s2207_s1, %s1530_s12  ;;  %v1459_v43 = vor.u32 %v1533_v39, %v1458_v38  ;;  %vm768_vm2 = vcmask 1043456   ;;  %vm764_vm3 = vcmask 64512   ;;  %vm954_vm4 = vcmask 1041409   ;;  %s1590_s12 = smov 64  }
   0xf   : > { %448 = vmatpush.bf16.msra.mxu1 %v1463_v2  ;;  %v308_v3 = vld [vmem:[%s1661_s15] sm:$0xff]  ;;  %v309_v4 = vld [vmem:[%s1661_s15 + $0x8] sm:$0xff]  ;;  %v310_v18 = vld [vmem:[%s1661_s15 + $0x10] sm:$0xff]  ;;  %vm957_vm5 = vcmask 1042434   ;;  %vm960_vm6 = vcmask 1043459   ;;  %vm963_vm7 = vcmask 1044484  }
  0x10   : > { %v1432_v5 = vld [vmem:[%s1661_s15 + $0x40] sm:$0xff]  ;;  %v1433_v6 = vld [vmem:[%s1661_s15 + $0x48] sm:$0xff]  ;;  %v311_v19 = vld [vmem:[%s1661_s15 + $0x18] sm:$0xff]  ;;  %419 = vmatpush.bf16.msra.mxu0 %v1459_v43  ;;  %vm966_vm8 = vcmask 1045509   ;;  %vm969_vm9 = vcmask 1046534   ;;  %vm972_vm10 = vcmask 1047559  }
  0x11   : > { %v325_v7 = vmax.f32 %v308_v3, %v1432_v5  ;;  %v1440_v8 = vld [vmem:[%s1661_s15 + $0x80] sm:$0xff]  ;;  %v1441_v9 = vld [vmem:[%s1661_s15 + $0x88] sm:$0xff]  ;;  %v326_v10 = vmax.f32 %v309_v4, %v1433_v6  ;;  %v1434_v20 = vld [vmem:[%s1661_s15 + $0x50] sm:$0xff]  ;;  %vm1256_vm11 = vcmask 261120   ;;  %vm1262_vm12 = vcmask 785408   ;;  %s1531_s17 = sshll.u32 %s2216_s30, 6 }
  0x12   : > { %v1448_v11 = vld [vmem:[%s1661_s15 + $0xc0] sm:$0xff]  ;;  %v1449_v12 = vld [vmem:[%s1661_s15 + $0xc8] sm:$0xff]  ;;  %v1435_v21 = vld [vmem:[%s1661_s15 + $0x58] sm:$0xff]  ;;  %v327_v26 = vmax.f32 %v310_v18, %v1434_v20  ;;  %s306_s20 = scalar_lea.vmem %s2214_s8, %s1531_s17 }
  0x13   : > { %v351_v13 = vmax.f32 %v1440_v8, %v1448_v11  ;;  %v352_v14 = vmax.f32 %v1441_v9, %v1449_v12  ;;  %v1442_v22 = vld [vmem:[%s1661_s15 + $0x90] sm:$0xff]  ;;  %v1443_v23 = vld [vmem:[%s1661_s15 + $0x98] sm:$0xff]  ;;  %v328_v27 = vmax.f32 %v311_v19, %v1435_v21  ;;  %v312_v33 = vld [vmem:[%s1661_s15 + $0x20] sm:$0xff] }
  0x14   : > { %v1450_v24 = vld [vmem:[%s1661_s15 + $0xd0] sm:$0xff]  ;;  %v1451_v25 = vld [vmem:[%s1661_s15 + $0xd8] sm:$0xff]  ;;  %v313_v34 = vld [vmem:[%s1661_s15 + $0x28] sm:$0xff] }
  0x15   : > { %v1671_v15 = vmax.f32 %v325_v7, %v351_v13  ;;  %v1673_v16 = vmax.f32 %v326_v10, %v352_v14  ;;  %v353_v28 = vmax.f32 %v1442_v22, %v1450_v24  ;;  %v354_v29 = vmax.f32 %v1443_v23, %v1451_v25  ;;  %v1436_v35 = vld [vmem:[%s1661_s15 + $0x60] sm:$0xff]  ;;  %v1437_v36 = vld [vmem:[%s1661_s15 + $0x68] sm:$0xff]  ;;  %v314_v51 = vld [vmem:[%s1661_s15 + $0x30] sm:$0xff] }
  0x16   : > { %v1444_v37 = vld [vmem:[%s1661_s15 + $0xa0] sm:$0xff]  ;;  %v1445_v40 = vld [vmem:[%s1661_s15 + $0xa8] sm:$0xff]  ;;  %v329_v44 = vmax.f32 %v312_v33, %v1436_v35  ;;  %v330_v45 = vmax.f32 %v313_v34, %v1437_v36  ;;  %v315_v52 = vld [vmem:[%s1661_s15 + $0x38] sm:$0xff] }
  0x17   : > { %v1677_v17 = vpack.c.bf16 %v1673_v16, %v1671_v15  ;;  %v1689_v30 = vmax.f32 %v327_v26, %v353_v28  ;;  %v1691_v31 = vmax.f32 %v328_v27, %v354_v29  ;;  %v1452_v41 = vld [vmem:[%s1661_s15 + $0xe0] sm:$0xff]  ;;  %v1453_v42 = vld [vmem:[%s1661_s15 + $0xe8] sm:$0xff]  ;;  %v1438_v53 = vld [vmem:[%s1661_s15 + $0x70] sm:$0xff] }
  0x18   : > { %v355_v46 = vmax.f32 %v1444_v37, %v1452_v41  ;;  %v356_v47 = vmax.f32 %v1445_v40, %v1453_v42  ;;  %v1439_v54 = vld [vmem:[%s1661_s15 + $0x78] sm:$0xff]  ;;  %v1446_v55 = vld [vmem:[%s1661_s15 + $0xb0] sm:$0xff]  ;;  %v331_v59 = vmax.f32 %v314_v51, %v1438_v53  ;;  %v1744_v3 = vld [vmem:[%s2209_s3] sm:$0x7] }
  0x19   : > { %1472 = vmatmul.msk.bf16.vlgmr.msra.gmra.mxu1 %vm399_vm0, %v1677_v17  ;;  %v1695_v32 = vpack.c.bf16 %v1691_v31, %v1689_v30  ;;  %1468 = vmatmul.msk.bf16.vlgmr.msra.gmra.mxu0 %vm399_vm0, %v1677_v17  ;;  %v1447_v56 = vld [vmem:[%s1661_s15 + $0xb8] sm:$0xff]  ;;  %v1454_v57 = vld [vmem:[%s1661_s15 + $0xf0] sm:$0xff]  ;;  %v332_v60 = vmax.f32 %v315_v52, %v1439_v54  ;;  %v378_v4 = vperm.slane %v1744_v3, 1  ;;  %v1466_v13 = vld [vmem:[%s2208_s2 + $0x8] sm:$0xf] }
  0x1a   : > { %v1715_v48 = vmax.f32 %v329_v44, %v355_v46  ;;  %v1717_v49 = vmax.f32 %v330_v45, %v356_v47  ;;  %v1455_v58 = vld [vmem:[%s1661_s15 + $0xf8] sm:$0xff]  ;;  %v357_v61 = vmax.f32 %v1446_v55, %v1454_v57  ;;  %v1534_v14 = vld [vmem:[%s2208_s2 + $0x10] sm:$0xf0] }
  0x1b   : > { %v358_v62 = vmax.f32 %v1447_v56, %v1455_v58  ;;  %v1467_v18 = vor.u32 %v1534_v14, %v1466_v13 }
  0x1c   : > { %v369_v50 = vpack.c.bf16 %v1717_v49, %v1715_v48  ;;  %v1732_v63 = vmax.f32 %v331_v59, %v357_v61 }
  0x1d   : > { %v1734_v0 = vmax.f32 %v332_v60, %v358_v62  ;;  %477 = vmatpush.bf16.msra.mxu2 %v1467_v18 }
  0x1f   : > { %v370_v1 = vpack.c.bf16 %v1734_v0, %v1732_v63 }
  0x20   : > { %1476 = vmatmul.msk.bf16.vlgmr.msra.gmra.mxu2 %vm399_vm0, %v1677_v17  ;;  %v377_v17 = vperm.slane %v1744_v3, 0 }
  0x29   : > { %1473 = vmatmul.msk.bf16.gmra.mxu1 %vm399_vm0, %v1695_v32  ;;  %1469 = vmatmul.msk.bf16.gmra.mxu0 %vm399_vm0, %v1695_v32 }
  0x30   : > { %1477 = vmatmul.msk.bf16.gmra.mxu2 %vm399_vm0, %v1695_v32 }
  0x39   : > { %1474 = vmatmul.msk.bf16.gmra.mxu1 %vm399_vm0, %v369_v50  ;;  %1470 = vmatmul.msk.bf16.gmra.mxu0 %vm399_vm0, %v369_v50 }
  0x40   : > { %1478 = vmatmul.msk.bf16.gmra.mxu2 %vm399_vm0, %v369_v50 }
  0x49   : > { %1475 = vmatmul.msk.bf16.gmra.mxu1 %vm399_vm0, %v370_v1  ;;  %1471 = vmatmul.msk.bf16.gmra.mxu0 %vm399_vm0, %v370_v1 }
  0x50   : > { %1479 = vmatmul.msk.bf16.gmra.mxu2 %vm399_vm0, %v370_v1 }
  0x96   : > { %v450_v2 = vpop.f32.mrf.mxu1  ;;  %v421_v24 = vpop.f32.mrf.mxu0 }
  0x97   : > { %v451_v6 = vadd.f32 %v450_v2, %v378_v4  ;;  %v422_v36 = vadd.f32 %v421_v24, %v377_v17 }
  0x9e   : > { %v452_v5 = vpop.f32.mrf.mxu1  ;;  %v423_v29 = vpop.f32.mrf.mxu0 }
  0x9f   : > { %v453_v7 = vadd.f32 %v452_v5, %v378_v4  ;;  %v424_v37 = vadd.f32 %v423_v29, %v377_v17 }
  0xa1   : > { %v503_v8 = vpack.c.bf16 %v453_v7, %v451_v6  ;;  %v499_v38 = vpack.c.bf16 %v424_v37, %v422_v36 }
  0xa3   : > { %v479_v54 = vpop.f32.mrf.mxu2 }
  0xa6   : > { %v455_v9 = vpop.f32.mrf.mxu1  ;;  %v426_v35 = vpop.f32.mrf.mxu0 }
  0xa7   : > { %v456_v33 = vadd.f32 %v455_v9, %v378_v4  ;;  %v427_v40 = vadd.f32 %v426_v35, %v377_v17 }
  0xab   : > { %v481_v55 = vpop.f32.mrf.mxu2 }
  0xae   : > { %v457_v10 = vpop.f32.mrf.mxu1  ;;  %v428_v39 = vpop.f32.mrf.mxu0 }
  0xaf   : > { %v458_v28 = vadd.f32 %v457_v10, %v378_v4  ;;  %v429_v41 = vadd.f32 %v428_v39, %v377_v17 }
  0xb1   : > { %v504_v34 = vpack.c.bf16 %v458_v28, %v456_v33  ;;  %v500_v42 = vpack.c.bf16 %v429_v41, %v427_v40 }
  0xb3   : > { %v484_v56 = vpop.f32.mrf.mxu2 }
  0xb6   : > { %v460_v11 = vpop.f32.mrf.mxu1  ;;  %v431_v32 = vpop.f32.mrf.mxu0 }
  0xb7   : > { %v461_v26 = vadd.f32 %v460_v11, %v378_v4  ;;  %v432_v44 = vadd.f32 %v431_v32, %v377_v17 }
  0xbb   : > { %v486_v57 = vpop.f32.mrf.mxu2 }
  0xbe   : > { %v462_v12 = vpop.f32.mrf.mxu1  ;;  %v433_v43 = vpop.f32.mrf.mxu0 }
  0xbf   : > { %v463_v25 = vadd.f32 %v462_v12, %v378_v4  ;;  %v434_v45 = vadd.f32 %v433_v43, %v377_v17 }
  0xc1   : > { %v505_v27 = vpack.c.bf16 %v463_v25, %v461_v26  ;;  %v501_v47 = vpack.c.bf16 %v434_v45, %v432_v44 }
  0xc3   : > { %v489_v58 = vpop.f32.mrf.mxu2 }
  0xc6   : > { %v465_v19 = vpop.f32.mrf.mxu1  ;;  %v436_v46 = vpop.f32.mrf.mxu0 }
  0xc7   : > { %v466_v21 = vadd.f32 %v465_v19, %v378_v4  ;;  %v437_v51 = vadd.f32 %v436_v46, %v377_v17 }
  0xcb   : > { %v491_v61 = vpop.f32.mrf.mxu2 }
  0xce   : > { %v467_v20 = vpop.f32.mrf.mxu1  ;;  %v438_v50 = vpop.f32.mrf.mxu0 }
  0xcf   : > { %v468_v22 = vadd.f32 %v467_v20, %v378_v4  ;;  %v439_v52 = vadd.f32 %v438_v50, %v377_v17  ;;  %v379_v4 = vperm.slane %v1744_v3, 2 }
  0xd1   : > { %v506_v23 = vpack.c.bf16 %v468_v22, %v466_v21  ;;  %v502_v53 = vpack.c.bf16 %v439_v52, %v437_v51  ;;  %v490_v10 = vadd.f32 %v489_v58, %v379_v4  ;;  %v492_v11 = vadd.f32 %v491_v61, %v379_v4 }
  0xd2   : > { %v485_v13 = vadd.f32 %v484_v56, %v379_v4  ;;  %v487_v14 = vadd.f32 %v486_v57, %v379_v4  ;;  %v480_v21 = vadd.f32 %v479_v54, %v379_v4  ;;  %v482_v3 = vadd.f32 %v481_v55, %v379_v4 }
  0xd3   : > { %515 = vmatpush.bf16.xpose.msra.mxu3 %v506_v23  ;;  %v494_v2 = vpop.f32.mrf.mxu2  ;;  %v509_v20 = vpack.c.bf16 %v492_v11, %v490_v10 }
  0xd4   : > { %v495_v7 = vadd.f32 %v494_v2, %v379_v4  ;;  %v508_v22 = vpack.c.bf16 %v487_v14, %v485_v13  ;;  %v507_v24 = vpack.c.bf16 %v482_v3, %v480_v21  ;;  %v1535_v21 = vld [vmem:[%s2210_s4] sm:$0xff] }
  0xd5   : > { %727 = vmatpush.bf16.msrb.mxu1 %v1535_v21 }
  0xdb   : > { %516 = vmatpush.bf16.xpose.msra.mxu3 %v505_v27 }
  0xe3   : > { %517 = vmatpush.bf16.xpose.msra.mxu3 %v504_v34 }
  0xeb   : > { %518 = vmatpush.bf16.xpose.msra.mxu3 %v503_v8  ;;  %v496_v8 = vpop.f32.mrf.mxu2 }
  0xec   : > { %v497_v9 = vadd.f32 %v496_v8, %v379_v4 }
  0xee   : > { %v510_v12 = vpack.c.bf16 %v497_v9, %v495_v7 }
  0xf0   : > { %633 = vmatpush.bf16.msrb.mxu0 %v510_v12 }
  0xf2   : > { %519 = vmatmul.bf16.vlgmr.msra.gmra.mxu3 %v499_v38 }
  0xf4   : > { %634 = vmatpush.bf16.msrb.mxu0 %v509_v20 }
  0xf8   : > { %635 = vmatpush.bf16.msrb.mxu0 %v508_v22 }
  0xfc   : > { %636 = vmatpush.bf16.msrb.mxu0 %v507_v24 }
 0x102   : > { %524 = vmatmul.bf16.gmra.mxu3 %v500_v42 }
 0x112   : > { %529 = vmatmul.bf16.gmra.mxu3 %v501_v47 }
 0x122   : > { %534 = vmatmul.bf16.gmra.mxu3 %v502_v53 }
 0x175   : > { %v520_v59 = vpop.f32.mrf.mxu3 }
 0x176   : > { %v541_v60 = vsel %vm540_vm1, %v520_v59, -inf }
 0x177   : > { %542 = vmax.xlane.f32.xlu0 %v541_v60 }
 0x17d   : > { %v522_v62 = vpop.f32.mrf.mxu3 }
 0x17e   : > { %v544_v1 = vsel %vm540_vm1, %v522_v62, -inf }
 0x17f   : > { %545 = vmax.xlane.f32.xlu0 %v544_v1 }
 0x185   : > { %v525_v5 = vpop.f32.mrf.mxu3 }
 0x186   : > { %v547_v6 = vsel %vm540_vm1, %v525_v5, -inf }
 0x187   : > { %548 = vmax.xlane.f32.xlu1 %v547_v6 }
 0x18d   : > { %v527_v18 = vpop.f32.mrf.mxu3 }
 0x18e   : > { %v550_v19 = vsel %vm540_vm1, %v527_v18, -inf }
 0x18f   : > { %551 = vmax.xlane.f32.xlu1 %v550_v19 }
 0x195   : > { %v530_v23 = vpop.f32.mrf.mxu3 }
 0x196   : > { %v553_v25 = vsel %vm540_vm1, %v530_v23, -inf }
 0x197   : > { %554 = vmax.xlane.f32.xlu2 %v553_v25 }
 0x19d   : > { %v532_v26 = vpop.f32.mrf.mxu3 }
 0x19e   : > { %v556_v27 = vsel %vm540_vm1, %v532_v26, -inf }
 0x19f   : > { %557 = vmax.xlane.f32.xlu2 %v556_v27 }
 0x1a5   : > { %v535_v28 = vpop.f32.mrf.mxu3 }
 0x1a6   : > { %v559_v29 = vsel %vm540_vm1, %v535_v28, -inf }
 0x1a7   : > { %560 = vmax.xlane.f32.xlu0 %v559_v29 }
 0x1ad   : > { %v537_v33 = vpop.f32.mrf.mxu3 }
 0x1ae   : > { %v562_v34 = vsel %vm540_vm1, %v537_v33, -inf }
 0x1af   : > { %563 = vmax.xlane.f32.xlu1 %v562_v34 }
 0x1ea   : > { %v543_v35 = vpop.xlane.xlu0 %542 }
 0x1eb   : > { %v565_v17 = vsub.f32 %v520_v59, %v543_v35 }
 0x1ed   : > { %v573_v36 = vmul.f32 1.442695, %v565_v17 }
 0x1ef   : > { %1550 = vpow2.f32 %v573_v36 }
 0x1f2   : > { %v546_v37 = vpop.xlane.xlu0 %545 }
 0x1f3   : > { %v566_v38 = vsub.f32 %v522_v62, %v546_v37 }
 0x1f5   : > { %v1551_v39 = vpop.eup %1550  ;;  %v575_v32 = vmul.f32 1.442695, %v566_v38 }
 0x1f6   : > { %v589_v40 = vsel %vm540_vm1, %v1551_v39, 0.0 }
 0x1f7   : > { %1552 = vpow2.f32 %v575_v32  ;;  %590 = vadd.xlane.f32.xlu2 %v589_v40 }
 0x1fa   : > { %v549_v41 = vpop.xlane.xlu1 %548 }
 0x1fb   : > { %v567_v42 = vsub.f32 %v525_v5, %v549_v41 }
 0x1fd   : > { %v1553_v43 = vpop.eup %1552  ;;  %v577_v44 = vmul.f32 1.442695, %v567_v42 }
 0x1fe   : > { %v592_v45 = vsel %vm540_vm1, %v1553_v43, 0.0  ;;  %v613_v46 = vpack.c.bf16 %v1553_v43, %v1551_v39 }
 0x1ff   : > { %1554 = vpow2.f32 %v577_v44  ;;  %593 = vadd.xlane.f32.xlu0 %v592_v45 }
 0x200   : > { %1480 = vmatmul.msk.bf16.vlgmr.msrb.gmra.mxu0 %vm540_vm1, %v613_v46 }
 0x202   : > { %v552_v47 = vpop.xlane.xlu1 %551 }
 0x203   : > { %v568_v50 = vsub.f32 %v527_v18, %v552_v47 }
 0x205   : > { %v1555_v51 = vpop.eup %1554  ;;  %v579_v52 = vmul.f32 1.442695, %v568_v50 }
 0x206   : > { %v595_v53 = vsel %vm540_vm1, %v1555_v51, 0.0 }
 0x207   : > { %1556 = vpow2.f32 %v579_v52  ;;  %596 = vadd.xlane.f32.xlu1 %v595_v53 }
 0x20a   : > { %v555_v54 = vpop.xlane.xlu2 %554 }
 0x20b   : > { %v569_v55 = vsub.f32 %v530_v23, %v555_v54 }
 0x20d   : > { %v1557_v56 = vpop.eup %1556  ;;  %v581_v57 = vmul.f32 1.442695, %v569_v55 }
 0x20e   : > { %v598_v58 = vsel %vm540_vm1, %v1557_v56, 0.0  ;;  %v614_v59 = vpack.c.bf16 %v1557_v56, %v1555_v51 }
 0x20f   : > { %1558 = vpow2.f32 %v581_v57  ;;  %599 = vadd.xlane.f32.xlu2 %v598_v58 }
 0x210   : > { %1481 = vmatmul.msk.bf16.gmra.mxu0 %vm540_vm1, %v614_v59 }
 0x212   : > { %v558_v60 = vpop.xlane.xlu2 %557 }
 0x213   : > { %v570_v61 = vsub.f32 %v532_v26, %v558_v60  ;;  %v675_v26 = vstv %s674_s28 }
 0x215   : > { %v1559_v62 = vpop.eup %1558  ;;  %v583_v1 = vmul.f32 1.442695, %v570_v61 }
 0x216   : > { %v601_v2 = vsel %vm540_vm1, %v1559_v62, 0.0 }
 0x217   : > { %1560 = vpow2.f32 %v583_v1  ;;  %602 = vadd.xlane.f32.xlu0 %v601_v2 }
 0x21a   : > { %v561_v4 = vpop.xlane.xlu0 %560 }
 0x21b   : > { %v571_v5 = vsub.f32 %v535_v28, %v561_v4 }
 0x21d   : > { %v1561_v6 = vpop.eup %1560  ;;  %v585_v7 = vmul.f32 1.442695, %v571_v5 }
 0x21e   : > { %v604_v8 = vsel %vm540_vm1, %v1561_v6, 0.0  ;;  %v615_v9 = vpack.c.bf16 %v1561_v6, %v1559_v62 }
 0x21f   : > { %1562 = vpow2.f32 %v585_v7  ;;  %605 = vadd.xlane.f32.xlu1 %v604_v8 }
 0x220   : > { %1482 = vmatmul.msk.bf16.gmra.mxu0 %vm540_vm1, %v615_v9 }
 0x222   : > { %v564_v10 = vpop.xlane.xlu1 %563 }
 0x223   : > { %v572_v11 = vsub.f32 %v537_v33, %v564_v10 }
 0x225   : > { %v1563_v12 = vpop.eup %1562  ;;  %v587_v13 = vmul.f32 1.442695, %v572_v11 }
 0x226   : > { %v607_v14 = vsel %vm540_vm1, %v1563_v12, 0.0 }
 0x227   : > { %1564 = vpow2.f32 %v587_v13  ;;  %608 = vadd.xlane.f32.xlu2 %v607_v14 }
 0x22d   : > { %v1565_v18 = vpop.eup %1564 }
 0x22e   : > { %v610_v19 = vsel %vm540_vm1, %v1565_v18, 0.0  ;;  %v616_v20 = vpack.c.bf16 %v1565_v18, %v1563_v12  ;;  %v1536_v18 = vld [vmem:[%s2212_s6] sm:$0xff] }
 0x22f   : > { %611 = vadd.xlane.f32.xlu0 %v610_v19 }
 0x230   : > { %1483 = vmatmul.msk.bf16.gmra.mxu0 %vm540_vm1, %v616_v20 }
 0x26a   : > { %v591_v3 = vpop.xlane.xlu2 %590 }
 0x26b   : > { %1566 = vrcp.f32 %v591_v3 }
 0x271   : > { %v1567_v24 = vpop.eup %1566 }
 0x272   : > { %v594_v22 = vpop.xlane.xlu0 %593 }
 0x273   : > { %1568 = vrcp.f32 %v594_v22 }
 0x279   : > { %v1569_v27 = vpop.eup %1568 }
 0x27a   : > { %v597_v34 = vpop.xlane.xlu1 %596 }
 0x27b   : > { %1570 = vrcp.f32 %v597_v34 }
 0x27d   : > { %v638_v23 = vpop.f32.mrf.mxu0 }
 0x27e   : > { %v666_v25 = vmul.f32 %v1567_v24, %v638_v23 }
 0x280   : > { %v676_v29 = vmul.f32 %v675_v26, %v666_v25 }
 0x281   : > { %v1571_v32 = vpop.eup %1570 }
 0x282   : > { %v684_v17 = vadd.f32 %v676_v29, %v1671_v15  ;;  %v600_v37 = vpop.xlane.xlu2 %599 }
 0x283   : > { %1572 = vrcp.f32 %v600_v37 }
 0x285   : > { %v640_v28 = vpop.f32.mrf.mxu0 }
 0x286   : > { %v667_v33 = vmul.f32 %v1569_v27, %v640_v28 }
 0x288   : > { %v677_v35 = vmul.f32 %v675_v26, %v667_v33 }
 0x289   : > { %v1573_v41 = vpop.eup %1572 }
 0x28a   : > { %v685_v36 = vadd.f32 %v677_v35, %v1673_v16  ;;  %v603_v45 = vpop.xlane.xlu0 %602 }
 0x28b   : > { %1574 = vrcp.f32 %v603_v45 }
 0x28c   : > { %v692_v38 = vpack.c.bf16 %v685_v36, %v684_v17 }
 0x28d   : > { %v643_v39 = vpop.f32.mrf.mxu0 }
 0x28e   : > { %1488 = vmatmul.msk.bf16.vlgmr.msrb.gmra.mxu1 %vm399_vm0, %v692_v38  ;;  %v668_v40 = vmul.f32 %v1571_v32, %v643_v39 }
 0x290   : > { %v678_v43 = vmul.f32 %v675_v26, %v668_v40 }
 0x291   : > { %v1575_v52 = vpop.eup %1574 }
 0x292   : > { %v686_v47 = vadd.f32 %v678_v43, %v1689_v30  ;;  %v606_v16 = vpop.xlane.xlu1 %605 }
 0x293   : > { %1576 = vrcp.f32 %v606_v16 }
 0x295   : > { %v645_v42 = vpop.f32.mrf.mxu0 }
 0x296   : > { %v669_v44 = vmul.f32 %v1573_v41, %v645_v42 }
 0x298   : > { %v679_v46 = vmul.f32 %v675_v26, %v669_v44 }
 0x299   : > { %v1577_v54 = vpop.eup %1576 }
 0x29a   : > { %v687_v15 = vadd.f32 %v679_v46, %v1691_v31  ;;  %v609_v58 = vpop.xlane.xlu2 %608 }
 0x29b   : > { %1578 = vrcp.f32 %v609_v58 }
 0x29c   : > { %v693_v50 = vpack.c.bf16 %v687_v15, %v686_v47 }
 0x29d   : > { %v648_v51 = vpop.f32.mrf.mxu0 }
 0x29e   : > { %1489 = vmatmul.msk.bf16.gmra.mxu1 %vm399_vm0, %v693_v50  ;;  %v670_v53 = vmul.f32 %v1575_v52, %v648_v51 }
 0x2a0   : > { %v680_v56 = vmul.f32 %v675_v26, %v670_v53 }
 0x2a1   : > { %v1579_v1 = vpop.eup %1578 }
 0x2a2   : > { %v688_v60 = vadd.f32 %v680_v56, %v1715_v48  ;;  %v612_v31 = vpop.xlane.xlu0 %611 }
 0x2a3   : > { %1580 = vrcp.f32 %v612_v31 }
 0x2a5   : > { %v650_v55 = vpop.f32.mrf.mxu0 }
 0x2a6   : > { %v671_v57 = vmul.f32 %v1577_v54, %v650_v55 }
 0x2a8   : > { %v681_v59 = vmul.f32 %v675_v26, %v671_v57 }
 0x2a9   : > { %v1581_v4 = vpop.eup %1580 }
 0x2aa   : > { %v689_v30 = vadd.f32 %v681_v59, %v1717_v49  ;;  %v1549_v49 = vld [vmem:[%s2211_s5] ss:$0 sm:$0xff] }
 0x2ac   : > { %v694_v61 = vpack.c.bf16 %v689_v30, %v688_v60 }
 0x2ad   : > { %v653_v62 = vpop.f32.mrf.mxu0 }
 0x2ae   : > { %1490 = vmatmul.msk.bf16.gmra.mxu1 %vm399_vm0, %v694_v61  ;;  %v672_v2 = vmul.f32 %v1579_v1, %v653_v62 }
 0x2b0   : > { %v682_v6 = vmul.f32 %v675_v26, %v672_v2 }
 0x2b2   : > { %v690_v9 = vadd.f32 %v682_v6, %v1732_v63 }
 0x2b5   : > { %v655_v5 = vpop.f32.mrf.mxu0 }
 0x2b6   : > { %v673_v7 = vmul.f32 %v1581_v4, %v655_v5 }
 0x2b8   : > { %v683_v8 = vmul.f32 %v675_v26, %v673_v7 }
 0x2ba   : > { %v691_v48 = vadd.f32 %v683_v8, %v1734_v0 }
 0x2bc   : > { %v695_v10 = vpack.c.bf16 %v691_v48, %v690_v9 }
 0x2be   : > { %1491 = vmatmul.msk.bf16.gmra.mxu1 %vm399_vm0, %v695_v10 }
 0x30b   : > { %v729_v11 = vpop.f32.mrf.mxu1 }
 0x30c   : > { %v730_v12 = vadd.f32 %v1549_v49, %v729_v11 }
 0x30e   : > { %v749_v13 = vpack.c.bf16 %v730_v12, %v730_v12 }
 0x310   : > { %v770_v14 = vsel %vm768_vm2, %v749_v13, 0 }
 0x311   : > { %779 = vmatpush.bf16.msrb.mxu2 %v770_v14 }
 0x313   : > { %v731_v63 = vpop.f32.mrf.mxu1 }
 0x314   : > { %v732_v0 = vadd.f32 %v1549_v49, %v731_v63  ;;  %1496 = vmatmul.msk.bf16.vlgmr.msrb.gmra.mxu2 %vm764_vm3, %v1536_v18 }
 0x316   : > { %v750_v19 = vpack.c.bf16 %v732_v0, %v732_v0 }
 0x318   : > { %v787_v20 = vsel %vm768_vm2, %v750_v19, 0 }
 0x319   : > { %796 = vmatpush.bf16.msra.mxu2 %v787_v20 }
 0x31b   : > { %v734_v21 = vpop.f32.mrf.mxu1 }
 0x31c   : > { %v735_v3 = vadd.f32 %v1549_v49, %v734_v21 }
 0x31e   : > { %v751_v22 = vpack.c.bf16 %v735_v3, %v735_v3 }
 0x320   : > { %v804_v23 = vsel %vm768_vm2, %v751_v22, 0 }
 0x321   : > { %813 = vmatpush.bf16.msrb.mxu3 %v804_v23 }
 0x323   : > { %v736_v24 = vpop.f32.mrf.mxu1 }
 0x324   : > { %v737_v25 = vadd.f32 %v1549_v49, %v736_v24  ;;  %1497 = vmatmul.msk.bf16.vlgmr.msra.gmra.mxu2 %vm764_vm3, %v1536_v18  ;;  %1498 = vmatmul.msk.bf16.vlgmr.msrb.gmra.mxu3 %vm764_vm3, %v1536_v18 }
 0x326   : > { %v752_v26 = vpack.c.bf16 %v737_v25, %v737_v25 }
 0x328   : > { %v821_v27 = vsel %vm768_vm2, %v752_v26, 0 }
 0x329   : > { %830 = vmatpush.bf16.msrb.mxu2 %v821_v27 }
 0x32b   : > { %v739_v28 = vpop.f32.mrf.mxu1 }
 0x32c   : > { %v740_v29 = vadd.f32 %v1549_v49, %v739_v28 }
 0x32e   : > { %v753_v33 = vpack.c.bf16 %v740_v29, %v740_v29 }
 0x330   : > { %v838_v34 = vsel %vm768_vm2, %v753_v33, 0 }
 0x331   : > { %847 = vmatpush.bf16.msra.mxu3 %v838_v34 }
 0x333   : > { %v741_v35 = vpop.f32.mrf.mxu1 }
 0x334   : > { %v742_v17 = vadd.f32 %v1549_v49, %v741_v35  ;;  %1499 = vmatmul.msk.bf16.vlgmr.msrb.gmra.mxu2 %vm764_vm3, %v1536_v18  ;;  %1500 = vmatmul.msk.bf16.vlgmr.msra.gmra.mxu3 %vm764_vm3, %v1536_v18 }
 0x336   : > { %v754_v36 = vpack.c.bf16 %v742_v17, %v742_v17 }
 0x338   : > { %v855_v37 = vsel %vm768_vm2, %v754_v36, 0 }
 0x339   : > { %864 = vmatpush.bf16.msra.mxu2 %v855_v37 }
 0x33b   : > { %v744_v38 = vpop.f32.mrf.mxu1 }
 0x33c   : > { %v745_v39 = vadd.f32 %v1549_v49, %v744_v38 }
 0x33e   : > { %v755_v32 = vpack.c.bf16 %v745_v39, %v745_v39 }
 0x340   : > { %v872_v40 = vsel %vm768_vm2, %v755_v32, 0 }
 0x341   : > { %881 = vmatpush.bf16.msrb.mxu3 %v872_v40 }
 0x343   : > { %v746_v41 = vpop.f32.mrf.mxu1 }
 0x344   : > { %v747_v42 = vadd.f32 %v1549_v49, %v746_v41  ;;  %1501 = vmatmul.msk.bf16.vlgmr.msra.gmra.mxu2 %vm764_vm3, %v1536_v18  ;;  %1502 = vmatmul.msk.bf16.vlgmr.msrb.gmra.mxu3 %vm764_vm3, %v1536_v18 }
 0x346   : > { %v756_v43 = vpack.c.bf16 %v747_v42, %v747_v42 }
 0x348   : > { %v889_v44 = vsel %vm768_vm2, %v756_v43, 0 }
 0x349   : > { %898 = vmatpush.bf16.msra.mxu0 %v889_v44 }
 0x34c   : > { %1503 = vmatmul.msk.bf16.vlgmr.msra.gmra.mxu0 %vm764_vm3, %v1536_v18 }
 0x397   : > { %v781_v45 = vpop.f32.mrf.mxu2 }
 0x398   : > { %v905_v47 = vpack.c.bf16 %v781_v45, %v781_v45 }
 0x39a   : > { %v929_v16 = vunpack.c.l.b16 %v905_v47 }
 0x39c   : > { %v1818_v53 = vunpack.i.l.s16 %v929_v16 }
 0x39e   : > { %v1058_v30 = vrot.slane %v1818_v53, 6  ;;  %v1041_v31 = vrot.slane %v1818_v53, 5  ;;  %v975_v61 = vrot.slane %v1818_v53, 1  ;;  %v1075_v62 = vrot.slane %v1818_v53, 7 }
 0x39f   : > { %v783_v46 = vpop.f32.mrf.mxu2  ;;  %v992_v1 = vrot.slane %v1818_v53, 2  ;;  %v1009_v2 = vrot.slane %v1818_v53, 3  ;;  %v1026_v20 = vrot.slane %v1818_v53, 4 }
 0x3a0   : > { %v906_v15 = vpack.c.bf16 %v783_v46, %v783_v46 }
 0x3a2   : > { %v1100_v50 = vunpack.c.l.b16 %v906_v15 }
 0x3a4   : > { %v1820_v56 = vunpack.i.l.s16 %v1100_v50 }
 0x3a6   : > { %v1139_v6 = vrot.slane %v1820_v56, 1  ;;  %v1205_v7 = vrot.slane %v1820_v56, 5  ;;  %v1173_v11 = vrot.slane %v1820_v56, 3  ;;  %v1156_v63 = vrot.slane %v1820_v56, 2 }
 0x3a7   : > { %v798_v51 = vpop.f32.mrf.mxu2  ;;  %v815_v52 = vpop.f32.mrf.mxu3  ;;  %v1239_v0 = vrot.slane %v1820_v56, 7  ;;  %v1222_v19 = vrot.slane %v1820_v56, 6 }
 0x3a8   : > { %v907_v54 = vpack.c.bf16 %v798_v51, %v798_v51  ;;  %v909_v55 = vpack.c.bf16 %v815_v52, %v815_v52 }
 0x3aa   : > { %v930_v57 = vunpack.c.l.b16 %v907_v54  ;;  %v931_v58 = vunpack.c.l.b16 %v909_v55 }
 0x3ac   : > { %v1822_v59 = vunpack.i.l.s16 %v930_v57  ;;  %v1824_v60 = vunpack.i.l.s16 %v931_v58 }
 0x3ae   : > { %v1059_v4 = vrot.slane %v1822_v59, 5  ;;  %v1042_v5 = vrot.slane %v1822_v59, 4  ;;  %v1061_v48 = vrot.slane %v1824_v60, 4  ;;  %v1044_v10 = vrot.slane %v1824_v60, 3 }
 0x3af   : > { %v800_v8 = vpop.f32.mrf.mxu2  ;;  %v817_v9 = vpop.f32.mrf.mxu3  ;;  %v1076_v49 = vrot.slane %v1822_v59, 6  ;;  %v976_v22 = vsel %vm954_vm4, %v1822_v59, %v975_v61  ;;  %v977_v23 = vrot.slane %v1824_v60, 7  ;;  %v993_v26 = vrot.slane %v1822_v59, 1 }
 0x3b0   : > { %v908_v12 = vpack.c.bf16 %v800_v8, %v800_v8  ;;  %v910_v13 = vpack.c.bf16 %v817_v9, %v817_v9  ;;  %v1060_v14 = vsel %vm954_vm4, %v1059_v4, %v1058_v30  ;;  %v1043_v18 = vsel %vm954_vm4, %v1042_v5, %v1041_v31 }
 0x3b1   : > { %v1062_v24 = vsel %vm957_vm5, %v1061_v48, %v1060_v14  ;;  %v1045_v25 = vsel %vm957_vm5, %v1044_v10, %v1043_v18  ;;  %v953_v27 = vrot.slane %v1822_v59, 7  ;;  %v1077_v33 = vsel %vm954_vm4, %v1076_v49, %v1075_v62 }
 0x3b2   : > { %v1101_v21 = vunpack.c.l.b16 %v908_v12  ;;  %v1102_v3 = vunpack.c.l.b16 %v910_v13  ;;  %v1010_v34 = vrot.slane %v1822_v59, 2  ;;  %v1078_v35 = vrot.slane %v1824_v60, 5 }
 0x3b3   : > { %v1012_v17 = vrot.slane %v1824_v60, 1  ;;  %v955_v36 = vsel %vm954_vm4, %v953_v27, %v1818_v53  ;;  %v956_v37 = vrot.slane %v1824_v60, 6  ;;  %v994_v38 = vsel %vm954_vm4, %v993_v26, %v992_v1 }
 0x3b4   : > { %v1853_v28 = vunpack.i.l.s16 %v1101_v21  ;;  %v1855_v29 = vunpack.i.l.s16 %v1102_v3  ;;  %v1011_v50 = vsel %vm954_vm4, %v1010_v34, %v1009_v2  ;;  %v978_v51 = vsel %vm957_vm5, %v977_v23, %v976_v22 }
 0x3b5   : > { %v1079_v52 = vsel %vm957_vm5, %v1078_v35, %v1077_v33  ;;  %v995_v30 = vsel %vm957_vm5, %v1824_v60, %v994_v38  ;;  %v1013_v2 = vsel %vm957_vm5, %v1012_v17, %v1011_v50 }
 0x3b6   : > { %v1140_v39 = vsel %vm954_vm4, %v1853_v28, %v1139_v6  ;;  %v1141_v32 = vrot.slane %v1855_v29, 7  ;;  %v1206_v40 = vrot.slane %v1853_v28, 4  ;;  %v1208_v43 = vrot.slane %v1855_v29, 3 }
 0x3b7   : > { %v832_v41 = vpop.f32.mrf.mxu2  ;;  %v849_v42 = vpop.f32.mrf.mxu3  ;;  %v1174_v44 = vrot.slane %v1853_v28, 2  ;;  %v1176_v45 = vrot.slane %v1855_v29, 1  ;;  %v1157_v46 = vrot.slane %v1853_v28, 1  ;;  %v1240_v6 = vrot.slane %v1853_v28, 6 }
 0x3b8   : > { %v911_v47 = vpack.c.bf16 %v832_v41, %v832_v41  ;;  %v913_v15 = vpack.c.bf16 %v849_v42, %v849_v42  ;;  %v1207_v16 = vsel %vm954_vm4, %v1206_v40, %v1205_v7  ;;  %v1882_v31 = vsel %vm957_vm5, %v1141_v32, %v1140_v39 }
 0x3b9   : > { %v1175_v54 = vsel %vm954_vm4, %v1174_v44, %v1173_v11  ;;  %v1158_v55 = vsel %vm954_vm4, %v1157_v46, %v1156_v63  ;;  %v1885_v61 = vsel %vm957_vm5, %v1208_v43, %v1207_v16  ;;  %v1899_v7 = vsel %vm957_vm5, %v956_v37, %v955_v36 }
 0x3ba   : > { %v932_v57 = vunpack.c.l.b16 %v911_v47  ;;  %v933_v58 = vunpack.c.l.b16 %v913_v15  ;;  %v1177_v62 = vsel %vm957_vm5, %v1176_v45, %v1175_v54  ;;  %v1890_v1 = vsel %vm957_vm5, %v1855_v29, %v1158_v55 }
 0x3bb   : > { %v1242_v8 = vrot.slane %v1855_v29, 5  ;;  %v1223_v9 = vrot.slane %v1853_v28, 5  ;;  %v1225_v48 = vrot.slane %v1855_v29, 4  ;;  %v1124_v10 = vrot.slane %v1853_v28, 7 }
 0x3bc   : > { %v1893_v4 = vunpack.i.l.s16 %v932_v57  ;;  %v1895_v5 = vunpack.i.l.s16 %v933_v58  ;;  %v1241_v17 = vsel %vm954_vm4, %v1240_v6, %v1239_v0  ;;  %v1126_v39 = vrot.slane %v1855_v29, 6 }
 0x3bd   : > { %v1224_v36 = vsel %vm954_vm4, %v1223_v9, %v1222_v19  ;;  %v1945_v46 = vsel %vm957_vm5, %v1242_v8, %v1241_v17 }
 0x3be   : > { %v1063_v49 = vrot.slane %v1893_v4, 3  ;;  %v1065_v11 = vrot.slane %v1895_v5, 2  ;;  %v1046_v12 = vrot.slane %v1893_v4, 2  ;;  %v1048_v13 = vrot.slane %v1895_v5, 1 }
 0x3bf   : > { %v834_v14 = vpop.f32.mrf.mxu2  ;;  %v851_v18 = vpop.f32.mrf.mxu3  ;;  %v979_v63 = vrot.slane %v1893_v4, 6  ;;  %v981_v21 = vrot.slane %v1895_v5, 5  ;;  %v1080_v3 = vrot.slane %v1893_v4, 4  ;;  %v1082_v22 = vrot.slane %v1895_v5, 3 }
 0x3c0   : > { %v912_v23 = vpack.c.bf16 %v834_v14, %v834_v14  ;;  %v914_v26 = vpack.c.bf16 %v851_v18, %v851_v18  ;;  %v1064_v27 = vsel %vm960_vm6, %v1063_v49, %v1062_v24  ;;  %v1047_v33 = vsel %vm960_vm6, %v1046_v12, %v1045_v25 }
 0x3c1   : > { %v980_v34 = vsel %vm960_vm6, %v979_v63, %v978_v51  ;;  %v1081_v35 = vsel %vm960_vm6, %v1080_v3, %v1079_v52  ;;  %v1027_v24 = vrot.slane %v1822_v59, 3  ;;  %v1066_v25 = vsel %vm963_vm7, %v1065_v11, %v1064_v27 }
 0x3c2   : > { %v1103_v37 = vunpack.c.l.b16 %v912_v23  ;;  %v1104_v38 = vunpack.c.l.b16 %v914_v26  ;;  %v1049_v32 = vsel %vm963_vm7, %v1048_v13, %v1047_v33  ;;  %v1928_v40 = vsel %vm963_vm7, %v981_v21, %v980_v34 }
 0x3c3   : > { %v996_v0 = vrot.slane %v1893_v4, 7  ;;  %v1936_v19 = vsel %vm963_vm7, %v1082_v22, %v1081_v35  ;;  %v998_v43 = vrot.slane %v1895_v5, 6  ;;  %v1941_v44 = vsel %vm960_vm6, %v1893_v4, %v1013_v2 }
 0x3c4   : > { %v1931_v41 = vunpack.i.l.s16 %v1103_v37  ;;  %v1933_v42 = vunpack.i.l.s16 %v1104_v38  ;;  %v1015_v45 = vrot.slane %v1895_v5, 7  ;;  %v1948_v47 = vsel %vm957_vm5, %v1225_v48, %v1224_v36 }
 0x3c5   : > { %v997_v15 = vsel %vm960_vm6, %v996_v0, %v995_v30  ;;  %v962_v12 = vrot.slane %v1895_v5, 4  ;;  %v1998_v35 = vsel %vm954_vm4, %v1124_v10, %v1820_v56 }
 0x3c6   : > { %v1143_v16 = vrot.slane %v1931_v41, 6  ;;  %v1145_v50 = vrot.slane %v1933_v42, 5  ;;  %v1210_v51 = vrot.slane %v1931_v41, 2  ;;  %v1212_v55 = vrot.slane %v1933_v42, 1 }
 0x3c7   : > { %v866_v52 = vpop.f32.mrf.mxu2  ;;  %v883_v54 = vpop.f32.mrf.mxu3  ;;  %v1178_v57 = vsel %vm960_vm6, %v1931_v41, %v1177_v62  ;;  %v1179_v58 = vrot.slane %v1933_v42, 7  ;;  %v1160_v2 = vrot.slane %v1931_v41, 7  ;;  %v1964_v49 = vsel %vm963_vm7, %v998_v43, %v997_v15 }
 0x3c8   : > { %v915_v6 = vpack.c.bf16 %v866_v52, %v866_v52  ;;  %v917_v30 = vpack.c.bf16 %v883_v54, %v883_v54  ;;  %v1144_v8 = vsel %vm960_vm6, %v1143_v16, %v1882_v31  ;;  %v1211_v9 = vsel %vm960_vm6, %v1210_v51, %v1885_v61 }
 0x3c9   : > { %v900_v48 = vpop.f32.mrf.mxu0  ;;  %v1161_v11 = vsel %vm960_vm6, %v1160_v2, %v1890_v1  ;;  %v959_v62 = vrot.slane %v1893_v4, 5  ;;  %v1162_v63 = vrot.slane %v1933_v42, 6  ;;  %v1972_v31 = vsel %vm963_vm7, %v1145_v50, %v1144_v8 }
 0x3ca   : > { %v934_v13 = vunpack.c.l.b16 %v915_v6  ;;  %v935_v14 = vunpack.c.l.b16 %v917_v30  ;;  %v919_v18 = vpack.c.bf16 %v900_v48, %v900_v48  ;;  %v1975_v61 = vsel %vm963_vm7, %v1212_v55, %v1211_v9 }
 0x3cb   : > { %v1978_v21 = vsel %vm963_vm7, %v1179_v58, %v1178_v57  ;;  %v1244_v1 = vrot.slane %v1931_v41, 4  ;;  %v1246_v26 = vrot.slane %v1933_v42, 3  ;;  %v1987_v27 = vsel %vm963_vm7, %v1162_v63, %v1161_v11 }
 0x3cc   : > { %v1981_v3 = vunpack.i.l.s16 %v934_v13  ;;  %v1983_v22 = vunpack.i.l.s16 %v935_v14  ;;  %v936_v23 = vunpack.c.l.b16 %v919_v18  ;;  %v1227_v33 = vrot.slane %v1931_v41, 3 }
 0x3cd   : > { %v1992_v34 = vsel %vm960_vm6, %v959_v62, %v1899_v7 }
 0x3ce   : > { %v2000_v17 = vunpack.i.l.s16 %v936_v23  ;;  %v1067_v36 = vrot.slane %v1981_v3, 1  ;;  %v1050_v37 = vsel %vm966_vm8, %v1981_v3, %v1049_v32  ;;  %v1051_v38 = vrot.slane %v1983_v22, 7 }
 0x3cf   : > { %v868_v0 = vpop.f32.mrf.mxu2  ;;  %v885_v43 = vpop.f32.mrf.mxu3  ;;  %v983_v7 = vrot.slane %v1981_v3, 4  ;;  %v985_v15 = vrot.slane %v1983_v22, 3  ;;  %v1084_v16 = vrot.slane %v1981_v3, 2  ;;  %v1086_v10 = vrot.slane %v1983_v22, 1 }
 0x3d0   : > { %v916_v50 = vpack.c.bf16 %v868_v0, %v868_v0  ;;  %v918_v51 = vpack.c.bf16 %v885_v43, %v885_v43  ;;  %v1068_v52 = vsel %vm966_vm8, %v1067_v36, %v1066_v25  ;;  %v1070_v54 = vrot.slane %v2000_v17, 7 }
 0x3d1   : > { %v902_v55 = vpop.f32.mrf.mxu0  ;;  %v1069_v32 = vsel %vm969_vm9, %v1983_v22, %v1068_v52  ;;  %v1052_v57 = vsel %vm969_vm9, %v1051_v38, %v1050_v37  ;;  %v1053_v58 = vrot.slane %v2000_v17, 6  ;;  %v984_v2 = vsel %vm966_vm8, %v983_v7, %v1928_v40 }
 0x3d2   : > { %v1105_v6 = vunpack.c.l.b16 %v916_v50  ;;  %v1106_v30 = vunpack.c.l.b16 %v918_v51  ;;  %v920_v8 = vpack.c.bf16 %v902_v55, %v902_v55  ;;  %v1071_v9 = vsel %vm972_vm10, %v1070_v54, %v1069_v32 }
 0x3d3   : > { %v1072_v48 = vpack.c.b16 %v1071_v9, %v1071_v9  ;;  %v1054_v25 = vsel %vm972_vm10, %v1053_v58, %v1052_v57  ;;  %v986_v11 = vsel %vm969_vm9, %v985_v15, %v984_v2  ;;  %v987_v62 = vrot.slane %v2000_v17, 2 }
 0x3d4   : > { %v2022_v13 = vunpack.i.l.s16 %v1105_v6  ;;  %v2024_v14 = vunpack.i.l.s16 %v1106_v30  ;;  %v1107_v18 = vunpack.c.l.b16 %v920_v8  ;;  %v1055_v63 = vpack.c.b16 %v1054_v25, %v1054_v25 }
 0x3d5   : > { %1073 = vrot.lane.b32.xlu0 %v1072_v48, %s1590_s12  ;;  %v988_v40 = vsel %vm972_vm10, %v987_v62, %v986_v11  ;;  %v1085_v23 = vsel %vm966_vm8, %v1084_v16, %v1936_v19  ;;  %v1000_v36 = vrot.slane %v1981_v3, 5  ;;  %v1002_v37 = vrot.slane %v1983_v22, 4 }
 0x3d6   : > { %v2032_v38 = vunpack.i.l.s16 %v1107_v18  ;;  %1056 = vrot.lane.b32.xlu1 %v1055_v63, %s1591_s13  ;;  %v989_v0 = vpack.c.b16 %v988_v40, %v988_v40  ;;  %v1087_v43 = vsel %vm969_vm9, %v1086_v10, %v1085_v23  ;;  %v1004_v7 = vrot.slane %v2000_v17, 3 }
 0x3d7   : > { %v1088_v15 = vsel %vm972_vm10, %v2000_v17, %v1087_v43  ;;  %v1001_v19 = vsel %vm966_vm8, %v1000_v36, %v1964_v49  ;;  %v1147_v16 = vrot.slane %v2022_v13, 4  ;;  %v1149_v50 = vrot.slane %v2024_v14, 3 }
 0x3d8   : > { %990 = vrot.lane.b32.xlu2 %v989_v0, %s1591_s13  ;;  %v1089_v51 = vpack.c.b16 %v1088_v15, %v1088_v15  ;;  %v1003_v52 = vsel %vm969_vm9, %v1002_v37, %v1001_v19  ;;  %v1151_v54 = vrot.slane %v2032_v38, 2  ;;  %v1214_v10 = vsel %vm966_vm8, %v2022_v13, %v1975_v61 }
 0x3d9   : > { %v1005_v55 = vsel %vm972_vm10, %v1004_v7, %v1003_v52  ;;  %v1148_v49 = vsel %vm966_vm8, %v1147_v16, %v1972_v31  ;;  %v1215_v32 = vrot.slane %v2024_v14, 7  ;;  %v1217_v57 = vrot.slane %v2032_v38, 6 }
 0x3da   : > { %v1006_v58 = vpack.c.b16 %v1005_v55, %v1005_v55  ;;  %v1150_v2 = vsel %vm969_vm9, %v1149_v50, %v1148_v49  ;;  %v1181_v6 = vrot.slane %v2022_v13, 6  ;;  %v1183_v30 = vrot.slane %v2024_v14, 5 }
 0x3db   : > { %v1152_v8 = vsel %vm972_vm10, %v1151_v54, %v1150_v2  ;;  %v1216_v61 = vsel %vm969_vm9, %v1215_v32, %v1214_v10  ;;  %v1185_v9 = vrot.slane %v2032_v38, 4  ;;  %v1164_v48 = vrot.slane %v2022_v13, 5 }
 0x3dc   : > { %v1153_v31 = vpack.c.b16 %v1152_v8, %v1152_v8  ;;  %v1218_v25 = vsel %vm972_vm10, %v1217_v57, %v1216_v61  ;;  %v1182_v11 = vsel %vm966_vm8, %v1181_v6, %v1978_v21  ;;  %v1166_v62 = vrot.slane %v2024_v14, 4 }
 0x3dd   : > { %1007 = vrot.lane.b32.xlu0 %v1006_v58, %s1590_s12  ;;  %v1184_v18 = vsel %vm969_vm9, %v1183_v30, %v1182_v11  ;;  %v1165_v63 = vsel %vm966_vm8, %v1164_v48, %v1987_v27  ;;  %v1168_v40 = vrot.slane %v2032_v38, 3  ;;  %v1229_v23 = vrot.slane %v1933_v42, 2 }
 0x3de   : > { %1090 = vrot.lane.b32.xlu1 %v1089_v51, %s1592_s14  ;;  %v1167_v36 = vsel %vm969_vm9, %v1166_v62, %v1165_v63  ;;  %v1017_v21 = vrot.slane %v1981_v3, 6  ;;  %v1019_v37 = vrot.slane %v1983_v22, 5  ;;  %v1245_v0 = vsel %vm960_vm6, %v1244_v1, %v1945_v46 }
 0x3df   : > { %v1219_v43 = vpack.c.b16 %v1218_v25, %v1218_v25  ;;  %v1186_v27 = vsel %vm972_vm10, %v1185_v9, %v1184_v18  ;;  %v1016_v7 = vsel %vm963_vm7, %v1015_v45, %v1941_v44  ;;  %v1228_v15 = vsel %vm960_vm6, %v1227_v33, %v1948_v47 }
 0x3e0   : > { %1154 = vrot.lane.b32.xlu2 %v1153_v31, %s1591_s13  ;;  %v1169_v19 = vsel %vm972_vm10, %v1168_v40, %v1167_v36  ;;  %v1018_v16 = vsel %vm966_vm8, %v1017_v21, %v1016_v7  ;;  %v1248_v46 = vrot.slane %v2022_v13, 2  ;;  %v1250_v1 = vrot.slane %v2024_v14, 1 }
 0x3e1   : > { %v1020_v50 = vsel %vm969_vm9, %v1019_v37, %v1018_v16  ;;  %v1021_v51 = vrot.slane %v2000_v17, 4  ;;  %v1247_v44 = vsel %vm963_vm7, %v1246_v26, %v1245_v0  ;;  %v1231_v45 = vrot.slane %v2022_v13, 1 }
 0x3e2   : > { %v1249_v47 = vsel %vm966_vm8, %v1248_v46, %v1247_v44  ;;  %v1230_v33 = vsel %vm963_vm7, %v1229_v23, %v1228_v15  ;;  %v964_v52 = vsel %vm963_vm7, %v962_v12, %v1992_v34  ;;  %v965_v54 = vrot.slane %v1981_v3, 3 }
 0x3e3   : > { %v1187_v10 = vpack.c.b16 %v1186_v27, %v1186_v27  ;;  %v1170_v55 = vpack.c.b16 %v1169_v19, %v1169_v19  ;;  %v1251_v49 = vsel %vm969_vm9, %v1250_v1, %v1249_v47  ;;  %v1232_v32 = vsel %vm966_vm8, %v1231_v45, %v1230_v33 }
 0x3e4   : > { %v1252_v26 = vsel %vm972_vm10, %v2032_v38, %v1251_v49  ;;  %v1234_v57 = vrot.slane %v2032_v38, 7  ;;  %v967_v58 = vsel %vm966_vm8, %v965_v54, %v964_v52  ;;  %v971_v2 = vrot.slane %v2000_v17, 1 }
 0x3e5   : > { %1188 = vrot.lane.b32.xlu0 %v1187_v10, %s1592_s14  ;;  %v1022_v12 = vsel %vm972_vm10, %v1021_v51, %v1020_v50  ;;  %v1233_v34 = vsel %vm969_vm9, %v2024_v14, %v1232_v32  ;;  %v968_v6 = vrot.slane %v1983_v22, 2  ;;  %v1127_v30 = vsel %vm957_vm5, %v1126_v39, %v1998_v35 }
 0x3e6   : > { %1220 = vrot.lane.b32.xlu1 %v1219_v43, %s1591_s13  ;;  %v1253_v8 = vpack.c.b16 %v1252_v26, %v1252_v26  ;;  %v1128_v61 = vrot.slane %v1931_v41, 5  ;;  %v1130_v9 = vrot.slane %v1933_v42, 4  ;;  %v1132_v48 = vrot.slane %v2022_v13, 3 }
 0x3e7   : > { %v970_v31 = vsel %vm969_vm9, %v968_v6, %v967_v58  ;;  %v1136_v25 = vrot.slane %v2032_v38, 1  ;;  %v1134_v11 = vrot.slane %v2024_v14, 2  ;;  %v1028_v39 = vsel %vm954_vm4, %v1027_v24, %v1026_v20 }
 0x3e8   : > { %1171 = vrot.lane.b32.xlu2 %v1170_v55, %s1590_s12  ;;  %v2136_v35 = vsel %vm972_vm10, %v971_v2, %v970_v31  ;;  %v1129_v62 = vsel %vm960_vm6, %v1128_v61, %v1127_v30  ;;  %v1029_v18 = vrot.slane %v1824_v60, 2  ;;  %v1031_v63 = vrot.slane %v1893_v4, 1  ;;  %v1537_v55 = vld [vmem:[%s2213_s7] sm:$0xff] }
 0x3e9   : > { %v1235_v40 = vsel %vm972_vm10, %v1234_v57, %v1233_v34  ;;  %v1131_v23 = vsel %vm963_vm7, %v1130_v9, %v1129_v62  ;;  %v1034_v53 = vrot.slane %v1981_v3, 7  ;;  %v1038_v59 = vrot.slane %v2000_v17, 5 }
 0x3ea   : > { %v1133_v20 = vsel %vm966_vm8, %v1132_v48, %v1131_v23  ;;  %v1030_v24 = vsel %vm957_vm5, %v1029_v18, %v1028_v39  ;;  %v1036_v36 = vrot.slane %v1983_v22, 6  ;;  %v1190_v21 = vrot.slane %v1820_v56, 4 }
 0x3eb   : > { %v1135_v60 = vsel %vm969_vm9, %v1134_v11, %v1133_v20  ;;  %v1032_v4 = vsel %vm960_vm6, %v1031_v63, %v1030_v24  ;;  %v1191_v37 = vrot.slane %v1853_v28, 3  ;;  %v1193_v0 = vrot.slane %v1855_v29, 2 }
 0x3ec   : > { %v1023_v43 = vpack.c.b16 %v1022_v12, %v1022_v12  ;;  %v1137_v3 = vsel %vm972_vm10, %v1136_v25, %v1135_v60  ;;  %v1033_v17 = vsel %vm963_vm7, %v1895_v5, %v1032_v4  ;;  %v1195_v27 = vrot.slane %v1931_v41, 1 }
 0x3ed   : > { %1254 = vrot.lane.b32.xlu0 %v1253_v8, %s1592_s14  ;;  %v1035_v56 = vsel %vm966_vm8, %v1034_v53, %v1033_v17  ;;  %v1192_v22 = vsel %vm954_vm4, %v1191_v37, %v1190_v21  ;;  %v1236_v7 = vpack.c.b16 %v1235_v40, %v1235_v40  ;;  %v1198_v41 = vrot.slane %v2022_v13, 7 }
 0x3ee   : > { %1024 = vrot.lane.b32.xlu1 %v1023_v43, %s1592_s14  ;;  %v1037_v28 = vsel %vm969_vm9, %v1036_v36, %v1035_v56  ;;  %v1194_v29 = vsel %vm957_vm5, %v1193_v0, %v1192_v22  ;;  %v1200_v16 = vrot.slane %v2024_v14, 6  ;;  %v1202_v1 = vrot.slane %v2032_v38, 5 }
 0x3ef   : > { %v1039_v15 = vsel %vm972_vm10, %v1038_v59, %v1037_v28  ;;  %v1196_v19 = vsel %vm960_vm6, %v1195_v27, %v1194_v29  ;;  %v1138_v49 = vpack.c.b16 %v1137_v3, %v1137_v3  ;;  %v974_v8 = vpack.c.b16 %v2136_v35, %v2136_v35 }
 0x3f0   : > { %1237 = vrot.lane.b32.xlu2 %v1236_v7, %s1590_s12  ;;  %v1197_v5 = vsel %vm963_vm7, %v1933_v42, %v1196_v19  ;;  %v1040_v52 = vpack.c.b16 %v1039_v15, %v1039_v15 }
 0x3f1   : > { %v1199_v46 = vsel %vm966_vm8, %v1198_v41, %v1197_v5 }
 0x3f2   : > { %v1201_v50 = vsel %vm969_vm9, %v1200_v16, %v1199_v46 }
 0x3f3   : > { %v1203_v51 = vsel %vm972_vm10, %v1202_v1, %v1201_v50 }
 0x3f4   : > { %v1204_v6 = vpack.c.b16 %v1203_v51, %v1203_v51 }
 0x432   : > { %v991_v44 = vpop.permute.xlu2 %990 }
 0x433   : > { %v1259_v9 = vsel %vm1256_vm11, %v974_v8, %v991_v44 }
 0x43a   : > { %v1155_v33 = vpop.permute.xlu2 %1154 }
 0x43b   : > { %v1274_v26 = vsel %vm1256_vm11, %v1138_v49, %v1155_v33 }
 0x442   : > { %v1172_v32 = vpop.permute.xlu2 %1171 }
 0x443   : > { %v1276_v57 = vsel %vm540_vm1, %v1274_v26, %v1172_v32 }
 0x447   : > { %v1074_v45 = vpop.permute.xlu0 %1073 }
 0x448   : > { %v1057_v47 = vpop.permute.xlu1 %1056 }
 0x449   : > { %v1267_v42 = vsel %vm1256_vm11, %v1040_v52, %v1057_v47 }
 0x44a   : > { %v1269_v14 = vsel %vm540_vm1, %v1267_v42, %v1074_v45  ;;  %v1238_v61 = vpop.permute.xlu2 %1237 }
 0x44f   : > { %v1008_v13 = vpop.permute.xlu0 %1007 }
 0x450   : > { %v1091_v54 = vpop.permute.xlu1 %1090  ;;  %v1261_v25 = vsel %vm540_vm1, %v1259_v9, %v1008_v13 }
 0x451   : > { %v1271_v10 = vsel %vm1262_vm12, %v1269_v14, %v1091_v54 }
 0x452   : > { %v1298_v38 = vsel %vm768_vm2, %v1271_v10, 0 }
 0x453   : > { %1325 = vmatpush.bf16.msrb.mxu2 %v1298_v38 }
 0x456   : > { %1525 = vmatmul.msk.bf16.vlgmr.msrb.gmra.mxu2 %vm764_vm3, %v1537_v55 }
 0x457   : > { %v1189_v58 = vpop.permute.xlu0 %1188 }
 0x458   : > { %v1221_v2 = vpop.permute.xlu1 %1220  ;;  %v1278_v12 = vsel %vm1262_vm12, %v1276_v57, %v1189_v58 }
 0x459   : > { %v1300_v34 = vsel %vm768_vm2, %v1278_v12, 0  ;;  %v1281_v30 = vsel %vm1256_vm11, %v1204_v6, %v1221_v2 }
 0x45a   : > { %1339 = vmatpush.bf16.msra.mxu3 %v1300_v34  ;;  %v1283_v31 = vsel %vm540_vm1, %v1281_v30, %v1238_v61 }
 0x45d   : > { %1526 = vmatmul.msk.bf16.vlgmr.msra.gmra.mxu3 %vm764_vm3, %v1537_v55 }
 0x45f   : > { %v1255_v48 = vpop.permute.xlu0 %1254 }
 0x460   : > { %v1025_v11 = vpop.permute.xlu1 %1024  ;;  %v1285_v39 = vsel %vm1262_vm12, %v1283_v31, %v1255_v48 }
 0x461   : > { %v1264_v62 = vsel %vm1262_vm12, %v1261_v25, %v1025_v11  ;;  %v1302_v18 = vsel %vm768_vm2, %v1285_v39, 0 }
 0x462   : > { %v1296_v35 = vsel %vm768_vm2, %v1264_v62, 0  ;;  %1353 = vmatpush.bf16.msrb.mxu0 %v1302_v18 }
 0x463   : > { %1311 = vmatpush.bf16.msra.mxu1 %v1296_v35 }
 0x465   : > { %1527 = vmatmul.msk.bf16.vlgmr.msrb.gmra.mxu0 %vm764_vm3, %v1537_v55 }
 0x466   : > { %1524 = vmatmul.msk.bf16.vlgmr.msra.gmra.mxu1 %vm764_vm3, %v1537_v55 }
 0x4d9   : > { %v1327_v63 = vpop.f32.mrf.mxu2 }
 0x4da   : > { %1361 = vst [vmem:[%s306_s20 + $0x8] sm:$0xff] %v1327_v63 }
 0x4e0   : > { %v1341_v40 = vpop.f32.mrf.mxu3 }
 0x4e1   : > { %1362 = vst [vmem:[%s306_s20 + $0x10] sm:$0xff] %v1341_v40  ;;  %v1329_v23 = vpop.f32.mrf.mxu2 }
 0x4e2   : > { %v1355_v53 = vpop.f32.mrf.mxu0  ;;  %1365 = vst [vmem:[%s306_s20 + $0x28] sm:$0xff] %v1329_v23 }
 0x4e3   : > { %v1313_v59 = vpop.f32.mrf.mxu1  ;;  %1363 = vst [vmem:[%s306_s20 + $0x18] sm:$0xff] %v1355_v53 }
 0x4e4   : > { %1360 = vst [vmem:[%s306_s20] sm:$0xff] %v1313_v59 }
 0x4e8   : > { %v1343_v20 = vpop.f32.mrf.mxu3 }
 0x4e9   : > { %1366 = vst [vmem:[%s306_s20 + $0x30] sm:$0xff] %v1343_v20 }
 0x4ea   : > { %v1357_v24 = vpop.f32.mrf.mxu0 }
 0x4eb   : > { %v1315_v36 = vpop.f32.mrf.mxu1  ;;  %1367 = vst [vmem:[%s306_s20 + $0x38] sm:$0xff] %v1357_v24 }
 0x4ec   : > { %1364 = vst [vmem:[%s306_s20 + $0x20] sm:$0xff] %v1315_v36 }
 0x4ed PF: > { %s19_s29 = sadd.s32 1, %s1588_s29  }
 0x4ee   : > { %p16_p4 = scmp.ge.s32.totalorder %s19_s29, 4  }
 0x4f0   :  { %18 = sbr.rel (!%p16_p4) target bundleno = 2 (0x2), region = 85 }

</bundles_post_ra>
